<compile_context>
chip_gen: v7x
topology: tpu7x:2x2x1
jax: 0.10.0
libtpu: 0.0.40
codegen_flags: <defaults>
</compile_context>

<pallas_src>
import functools
import math

import jax
import jax.numpy as jnp
from jax.experimental import pallas as pl
from jax.experimental.pallas import tpu as pltpu

# Lane-aligned padded widths: 80->128, 320->384 (hidden), 640 stays 640.
# The OUTPUT width stays at the true 320 (block == full array dim is legal and
# avoids a post-kernel slice pass).
_D_IN, _D1, _D2, _D3, _D_OUT = 128, 384, 640, 640, 320
_BIAS_LEN = _D1 + _D2 + _D3 + _D_OUT                       # 1984
_MACS_PER_ROW = _D_IN * _D1 + _D1 * _D2 + _D2 * _D3 + _D3 * _D_OUT
_WEIGHT_BYTES = 2 * _MACS_PER_ROW                           # bf16 weights


def _qnet_kernel(x_ref, w1_ref, w2_ref, w3_ref, w4_ref, b_ref, o_ref):
    # x_ref is already bf16 (cast fused into the wrapper's pad pass).
    # Layer 1: (TM, 128) @ (128, 384) + b1, ReLU
    h = jnp.dot(x_ref[...], w1_ref[...], preferred_element_type=jnp.float32)
    h = jnp.maximum(h + b_ref[:, 0:_D1], 0.0)
    # Layer 2: (TM, 384) @ (384, 640) + b2, ReLU
    h = jnp.dot(h.astype(jnp.bfloat16), w2_ref[...],
                preferred_element_type=jnp.float32)
    h = jnp.maximum(h + b_ref[:, _D1:_D1 + _D2], 0.0)
    # Layer 3: (TM, 640) @ (640, 640) + b3, ReLU
    h = jnp.dot(h.astype(jnp.bfloat16), w3_ref[...],
                preferred_element_type=jnp.float32)
    h = jnp.maximum(h + b_ref[:, _D1 + _D2:_D1 + _D2 + _D3], 0.0)
    # Layer 4: (TM, 640) @ (640, 320) + b4   (no activation)
    h = jnp.dot(h.astype(jnp.bfloat16), w4_ref[...],
                preferred_element_type=jnp.float32)
    o_ref[...] = (h + b_ref[:, _D1 + _D2 + _D3:_BIAS_LEN]).astype(o_ref.dtype)


def _pick_tm(m, tm_req):
    """Row-tile selection.

    - multiple of 16 (bf16 input needs (16, 128) min tiles), clamped to [16, 512]
    - never larger than the (rounded-up) batch
    - halved when that still leaves >= 2 grid steps, so the "parallel" grid
      axis can shard across v7x's two TensorCores (grid=1 would idle one TC).
    For large M the halving clamp is inactive and tm stays at the requested
    256 (or 512), keeping the 256-row MXU fill on v6e/v7x.
    """
    tm = max(16, min(512, (int(tm_req) // 16) * 16))
    rows16 = ((m + 15) // 16) * 16
    tm = min(tm, rows16)
    if rows16 >= 32:
        half = ((rows16 // 2) + 15) // 16 * 16
        tm = min(tm, half)
    return tm


@functools.partial(jax.jit, static_argnames=("tm",))
def qnet_forward_batched(x, params, *, tm=256):
    """x: (M, 80) float32 -> (M, 320) float32."""
    w1, w2, w3, w4, bias = params
    m = x.shape[0]
    tm_ = _pick_tm(m, tm)
    m_pad = ((m + tm_ - 1) // tm_) * tm_

    # Fused pad + bf16 cast: half the input DMA bytes, no in-kernel cast for
    # the first matmul.  Zero-padding keeps the math exact.
    x_pad = jnp.zeros((m_pad, _D_IN), jnp.bfloat16).at[:m, :80].set(
        x.astype(jnp.bfloat16))

    grid = (m_pad // tm_,)
    flops = 2 * m_pad * _MACS_PER_ROW
    bytes_accessed = (_WEIGHT_BYTES + 4 * _BIAS_LEN
                      + 2 * m_pad * _D_IN + 4 * m_pad * _D_OUT)

    out = pl.pallas_call(
        _qnet_kernel,
        out_shape=jax.ShapeDtypeStruct((m_pad, _D_OUT), jnp.float32),
        grid_spec=pltpu.PrefetchScalarGridSpec(
            num_scalar_prefetch=0,
            grid=grid,
            in_specs=[
                pl.BlockSpec((tm_, _D_IN), lambda i: (i, 0)),
                # Weights / bias: constant block index -> VMEM-resident across
                # all grid steps (no re-DMA per row tile).  Their default
                # double buffer costs < 2 MiB, far inside every generation's
                # VMEM, so pl.Buffered(1) was deliberately not applied.
                pl.BlockSpec((_D_IN, _D1), lambda i: (0, 0)),
                pl.BlockSpec((_D1, _D2), lambda i: (0, 0)),
                pl.BlockSpec((_D2, _D3), lambda i: (0, 0)),
                pl.BlockSpec((_D3, _D_OUT), lambda i: (0, 0)),
                pl.BlockSpec((1, _BIAS_LEN), lambda i: (0, 0)),
            ],
            out_specs=pl.BlockSpec((tm_, _D_OUT), lambda i: (i, 0)),
        ),
        compiler_params=pltpu.CompilerParams(
            dimension_semantics=("parallel",),
        ),
        cost_estimate=pl.CostEstimate(
            flops=flops, transcendentals=0, bytes_accessed=bytes_accessed),
    )(x_pad, w1, w2, w3, w4, bias)

    # Only the row padding (if any) is un-padded; no lane slice remains.
    return out if m == m_pad else out[:m]


@jax.jit
def qnet_forward(x, params):
    """Torch-equivalent forward: (1, 80) -> (4, 10, 8)."""
    x = x.reshape(1, 80)
    out = qnet_forward_batched(x, params, tm=16)   # bf16 min sublane tile = 16
    return out.reshape(4, 10, 8)


def init_params(key):
    """Torch-matching init (xavier_uniform_ weights, default Linear bias),
    stored pre-transposed as (in, out), zero-padded to lane-aligned shapes
    (output width of fc4 stays at the true 320), weights cast to bf16, biases
    packed into one (1, 1984) f32 array at 128-aligned offsets."""
    dims = [(80, 320), (320, 640), (640, 640), (640, 320)]
    pads = [(_D_IN, _D1), (_D1, _D2), (_D2, _D3), (_D3, _D_OUT)]
    ws, bs = [], []
    for i, ((fi, fo), (pi, po)) in enumerate(zip(dims, pads)):
        kw, kb = jax.random.split(jax.random.fold_in(key, i))
        a = math.sqrt(6.0 / (fi + fo))                      # xavier_uniform_
        w = jax.random.uniform(kw, (fi, fo), jnp.float32, -a, a)
        bound = 1.0 / math.sqrt(fi)                         # torch bias default
        b = jax.random.uniform(kb, (fo,), jnp.float32, -bound, bound)
        w_pad = jnp.zeros((pi, po), jnp.float32).at[:fi, :fo].set(w)
        b_pad = jnp.zeros((po,), jnp.float32).at[:fo].set(b)
        ws.append(w_pad.astype(jnp.bfloat16))
        bs.append(b_pad)
    bias = jnp.concatenate(bs).reshape(1, _BIAS_LEN)
    return (ws[0], ws[1], ws[2], ws[3], bias)


def _reference(x, params):
    """Pure-JAX reference applying the same bf16 quantization as the kernel."""
    w1, w2, w3, w4, bias = params
    b1 = bias[:, 0:_D1]
    b2 = bias[:, _D1:_D1 + _D2]
    b3 = bias[:, _D1 + _D2:_D1 + _D2 + _D3]
    b4 = bias[:, _D1 + _D2 + _D3:_BIAS_LEN]
    m = x.shape[0]
    xp = jnp.zeros((m, _D_IN), jnp.bfloat16).at[:, :80].set(
        x.astype(jnp.bfloat16))
    h = jnp.dot(xp, w1, preferred_element_type=jnp.float32)
    h = jnp.maximum(h + b1, 0.0)
    h = jnp.dot(h.astype(jnp.bfloat16), w2, preferred_element_type=jnp.float32)
    h = jnp.maximum(h + b2, 0.0)
    h = jnp.dot(h.astype(jnp.bfloat16), w3, preferred_element_type=jnp.float32)
    h = jnp.maximum(h + b3, 0.0)
    h = jnp.dot(h.astype(jnp.bfloat16), w4, preferred_element_type=jnp.float32)
    return h + b4


if __name__ == "__main__":
    key = jax.random.PRNGKey(0)
    k_x, k_xb, k_p = jax.random.split(key, 3)
    params = init_params(k_p)

    # 1) Module-equivalent path: batch=1 -> (4, 10, 8), matching torch .view.
    x1 = jax.random.normal(k_x, (1, 80), jnp.float32)
    out1 = qnet_forward(x1, params)
    jax.block_until_ready(out1)
    ref1 = _reference(x1, params).reshape(4, 10, 8)
    assert out1.shape == (4, 10, 8)
    assert jnp.allclose(out1, ref1, atol=2e-2, rtol=2e-2)

    # 2) Batched throughput path: 256 rows -> tm auto-picked at 128 so the
    #    "parallel" grid has 2 steps (both v7x TensorCores busy); weights stay
    #    VMEM-resident across both steps.
    xb = jax.random.normal(k_xb, (256, 80), jnp.float32)
    outb = qnet_forward_batched(xb, params)
    jax.block_until_ready(outb)
    refb = _reference(xb, params)
    assert outb.shape == (256, 320)
    assert jnp.allclose(outb, refb, atol=2e-2, rtol=2e-2)

    print("KERNEL_OK")
</pallas_src>

<mosaic_0001>
module attributes {stable_mosaic.version = 11 : i64} {
  func.func @_qnet_kernel(%arg0: i32, %arg1: memref<16x128xbf16, #tpu.memory_space<vmem>>, %arg2: memref<128x384xbf16, #tpu.memory_space<vmem>>, %arg3: memref<384x640xbf16, #tpu.memory_space<vmem>>, %arg4: memref<640x640xbf16, #tpu.memory_space<vmem>>, %arg5: memref<640x320xbf16, #tpu.memory_space<vmem>>, %arg6: memref<1x1984xf32, #tpu.memory_space<vmem>>, %arg7: memref<16x320xf32, #tpu.memory_space<vmem>>) attributes {dimension_semantics = [#tpu.dimension_semantics<parallel>], iteration_bounds = array<i64: 1>, scalar_prefetch = 0 : i64, scratch_operands = 0 : i64, tpu.core_type = #tpu.core_type<tc>, window_params = [{transform_indices = @transform_0, window_bounds = array<i64: 16, 128>}, {pipeline_mode = #tpu.pipeline_mode<synchronous>, transform_indices = @transform_1, window_bounds = array<i64: 128, 384>}, {pipeline_mode = #tpu.pipeline_mode<synchronous>, transform_indices = @transform_2, window_bounds = array<i64: 384, 640>}, {pipeline_mode = #tpu.pipeline_mode<synchronous>, transform_indices = @transform_3, window_bounds = array<i64: 640, 640>}, {pipeline_mode = #tpu.pipeline_mode<synchronous>, transform_indices = @transform_4, window_bounds = array<i64: 640, 320>}, {pipeline_mode = #tpu.pipeline_mode<synchronous>, transform_indices = @transform_5, window_bounds = array<i64: 1, 1984>}, {transform_indices = @transform_6, window_bounds = array<i64: 16, 320>}]} {
    %c0 = arith.constant 0 : index
    %c0_0 = arith.constant 0 : index
    %0 = vector.load %arg1[%c0, %c0_0] : memref<16x128xbf16, #tpu.memory_space<vmem>>, vector<16x128xbf16>
    %c0_1 = arith.constant 0 : index
    %c0_2 = arith.constant 0 : index
    %1 = vector.load %arg2[%c0_1, %c0_2] : memref<128x384xbf16, #tpu.memory_space<vmem>>, vector<128x384xbf16>
    %cst = arith.constant dense<0.000000e+00> : vector<16x384xf32>
    %2 = tpu.matmul %0, %1, %cst {dimension_numbers = #tpu.dot_dimension_numbers<[1], [0], [0], [1], [0, 0, 1, 1], [], []>} : vector<16x128xbf16>, vector<128x384xbf16>, vector<16x384xf32> -> vector<16x384xf32>
    %c0_3 = arith.constant 0 : index
    %c0_4 = arith.constant 0 : index
    %3 = vector.load %arg6[%c0_3, %c0_4] : memref<1x1984xf32, #tpu.memory_space<vmem>>, vector<1x384xf32>
    %4 = vector.broadcast %3 : vector<1x384xf32> to vector<16x384xf32>
    %5 = arith.addf %2, %4 : vector<16x384xf32>
    %cst_5 = arith.constant 0.000000e+00 : f32
    %6 = vector.broadcast %cst_5 : f32 to vector<16x384xf32>
    %7 = arith.maximumf %5, %6 : vector<16x384xf32>
    %8 = arith.truncf %7 : vector<16x384xf32> to vector<16x384xbf16>
    %c0_6 = arith.constant 0 : index
    %c0_7 = arith.constant 0 : index
    %9 = vector.load %arg3[%c0_6, %c0_7] : memref<384x640xbf16, #tpu.memory_space<vmem>>, vector<384x640xbf16>
    %cst_8 = arith.constant dense<0.000000e+00> : vector<16x640xf32>
    %10 = tpu.matmul %8, %9, %cst_8 {dimension_numbers = #tpu.dot_dimension_numbers<[1], [0], [0], [1], [0, 0, 1, 1], [], []>} : vector<16x384xbf16>, vector<384x640xbf16>, vector<16x640xf32> -> vector<16x640xf32>
    %c0_9 = arith.constant 0 : index
    %c384 = arith.constant 384 : index
    %11 = vector.load %arg6[%c0_9, %c384] : memref<1x1984xf32, #tpu.memory_space<vmem>>, vector<1x640xf32>
    %12 = vector.broadcast %11 : vector<1x640xf32> to vector<16x640xf32>
    %13 = arith.addf %10, %12 : vector<16x640xf32>
    %cst_10 = arith.constant 0.000000e+00 : f32
    %14 = vector.broadcast %cst_10 : f32 to vector<16x640xf32>
    %15 = arith.maximumf %13, %14 : vector<16x640xf32>
    %16 = arith.truncf %15 : vector<16x640xf32> to vector<16x640xbf16>
    %c0_11 = arith.constant 0 : index
    %c0_12 = arith.constant 0 : index
    %17 = vector.load %arg4[%c0_11, %c0_12] : memref<640x640xbf16, #tpu.memory_space<vmem>>, vector<640x640xbf16>
    %cst_13 = arith.constant dense<0.000000e+00> : vector<16x640xf32>
    %18 = tpu.matmul %16, %17, %cst_13 {dimension_numbers = #tpu.dot_dimension_numbers<[1], [0], [0], [1], [0, 0, 1, 1], [], []>} : vector<16x640xbf16>, vector<640x640xbf16>, vector<16x640xf32> -> vector<16x640xf32>
    %c0_14 = arith.constant 0 : index
    %c1024 = arith.constant 1024 : index
    %19 = vector.load %arg6[%c0_14, %c1024] : memref<1x1984xf32, #tpu.memory_space<vmem>>, vector<1x640xf32>
    %20 = vector.broadcast %19 : vector<1x640xf32> to vector<16x640xf32>
    %21 = arith.addf %18, %20 : vector<16x640xf32>
    %cst_15 = arith.constant 0.000000e+00 : f32
    %22 = vector.broadcast %cst_15 : f32 to vector<16x640xf32>
    %23 = arith.maximumf %21, %22 : vector<16x640xf32>
    %24 = arith.truncf %23 : vector<16x640xf32> to vector<16x640xbf16>
    %c0_16 = arith.constant 0 : index
    %c0_17 = arith.constant 0 : index
    %25 = vector.load %arg5[%c0_16, %c0_17] : memref<640x320xbf16, #tpu.memory_space<vmem>>, vector<640x320xbf16>
    %cst_18 = arith.constant dense<0.000000e+00> : vector<16x320xf32>
    %26 = tpu.matmul %24, %25, %cst_18 {dimension_numbers = #tpu.dot_dimension_numbers<[1], [0], [0], [1], [0, 0, 1, 1], [], []>} : vector<16x640xbf16>, vector<640x320xbf16>, vector<16x320xf32> -> vector<16x320xf32>
    %c0_19 = arith.constant 0 : index
    %c1664 = arith.constant 1664 : index
    %27 = vector.load %arg6[%c0_19, %c1664] : memref<1x1984xf32, #tpu.memory_space<vmem>>, vector<1x320xf32>
    %28 = vector.broadcast %27 : vector<1x320xf32> to vector<16x320xf32>
    %29 = arith.addf %26, %28 : vector<16x320xf32>
    %c0_20 = arith.constant 0 : index
    %c0_21 = arith.constant 0 : index
    %30 = vector.load %arg7[%c0_20, %c0_21] : memref<16x320xf32, #tpu.memory_space<vmem>>, vector<16x320xf32>
    tpu.vector_store %arg7[%c0_20, %c0_21], %29 {strides = array<i32>} : memref<16x320xf32, #tpu.memory_space<vmem>>, vector<16x320xf32>,
    return
  }
  func.func @transform_0(%arg0: i32) -> (i32, i32) {
    %c0_i32 = arith.constant 0 : i32
    %c0_i32_0 = arith.constant 0 : i32
    return %arg0, %c0_i32 : i32, i32
  }
  func.func @transform_1(%arg0: i32) -> (i32, i32) {
    %c0_i32 = arith.constant 0 : i32
    %c0_i32_0 = arith.constant 0 : i32
    %c0_i32_1 = arith.constant 0 : i32
    return %c0_i32, %c0_i32_0 : i32, i32
  }
  func.func @transform_2(%arg0: i32) -> (i32, i32) {
    %c0_i32 = arith.constant 0 : i32
    %c0_i32_0 = arith.constant 0 : i32
    %c0_i32_1 = arith.constant 0 : i32
    return %c0_i32, %c0_i32_0 : i32, i32
  }
  func.func @transform_3(%arg0: i32) -> (i32, i32) {
    %c0_i32 = arith.constant 0 : i32
    %c0_i32_0 = arith.constant 0 : i32
    %c0_i32_1 = arith.constant 0 : i32
    return %c0_i32, %c0_i32_0 : i32, i32
  }
  func.func @transform_4(%arg0: i32) -> (i32, i32) {
    %c0_i32 = arith.constant 0 : i32
    %c0_i32_0 = arith.constant 0 : i32
    %c0_i32_1 = arith.constant 0 : i32
    return %c0_i32, %c0_i32_0 : i32, i32
  }
  func.func @transform_5(%arg0: i32) -> (i32, i32) {
    %c0_i32 = arith.constant 0 : i32
    %c0_i32_0 = arith.constant 0 : i32
    %c0_i32_1 = arith.constant 0 : i32
    return %c0_i32, %c0_i32_0 : i32, i32
  }
  func.func @transform_6(%arg0: i32) -> (i32, i32) {
    %c0_i32 = arith.constant 0 : i32
    %c0_i32_0 = arith.constant 0 : i32
    return %arg0, %c0_i32 : i32, i32
  }
}

</mosaic_0001>

<bundles_post_ra>
// kernel: qnet_forward_batched.1
= control target key start
LH: loop header
LB: loop body
LE: loop exit
PB: predicated region body
PF: predicated region fallthrough
CT: control target
= control target key end

     0   :  { %11 = vsyncpa [#allocation3], 0  ;;  %s6818_s0 = inlined_call_operand.vmem [shape: bf16[16,128], index: 0, kind: input, shape index: {}]   ;;  %s6819_s1 = inlined_call_operand.hbm [shape: bf16[128,384], index: 1, kind: input, shape index: {}]   ;;  %s6820_s2 = inlined_call_operand.hbm [shape: bf16[384,640], index: 2, kind: input, shape index: {}]   ;;  %s6821_s3 = inlined_call_operand.vmem [shape: bf16[640,640], index: 3, kind: input, shape index: {}]   ;;  %s6822_s4 = inlined_call_operand.vmem [shape: bf16[640,320], index: 4, kind: input, shape index: {}]   ;;  %s6823_s5 = inlined_call_operand.vmem [shape: f32[1,1984], index: 5, kind: input, shape index: {}]   ;;  %s6824_s6 = inlined_call_operand.vmem [shape: f32[16,320], index: 6, kind: output, shape index: {}]  }
   0x1   :  { %12 = vsyncpa [#allocation5], 0  ;;  %s5620_s21 = smov [#allocation2]   ;;  %s5572_s25 = scalar_lea.hbm %s6819_s1, 3072 }
   0x2   :  { %s20_s22 = sshll.u32 %s5620_s21, 4  ;;  %p5573_p0 = scmp.ne.s32.totalorder %s6819_s1, %s5572_s25  ;;  %s21_s22 = int_to_ptr.vmem [resolvable:$true] %s20_s22 }
   0x3   :  { %p5576_p1 = scmp.lt.u32.totalorder %s5572_s25, %s6819_s1 }
   0x5   :  { %p5578_p2 = pnand %p5576_p1, %p5573_p0 }
   0x7   :  { %5581 = shalt.err (!%p5578_p2)
}
   0x8   :  { %s5582_s30 = scalar_lea.vmem %s21_s22, 3072  ;;  %p5587_p4 = scmp.lt.s32.totalorder %s21_s22, %s21_s22 }
   0x9   :  { %p5583_p3 = scmp.ne.s32.totalorder %s21_s22, %s5582_s30  ;;  %p5588_p5 = scmp.lt.s32.totalorder %s5582_s30, %s5582_s30 }
   0xb   :  { %p5589_p6 = por %p5588_p5, %p5587_p4 }
   0xd   :  { %p5590_p7 = pnand %p5589_p6, %p5583_p3 }
   0xf   :  { %5593 = shalt.err (!%p5590_p7)
}
  0x10   :  { %s5621_s7 = smov 192   ;;  %s5622_s8 = smov 12  }
  0x11   :  { %26 = dma.hbm_to_vmem [thread:$0]  %s6819_s1, 3072, %s21_s22, [#allocation3], %s5621_s7, %s5621_s7, %s5622_s8  }
  0x12   :  { %s5623_s11 = smov [#allocation4]   ;;  %s5594_s15 = scalar_lea.hbm %s6820_s2, 15360 }
  0x13   :  { %s32_s12 = sshll.u32 %s5623_s11, 4  ;;  %p5595_p8 = scmp.ne.s32.totalorder %s6820_s2, %s5594_s15  ;;  %s33_s12 = int_to_ptr.vmem [resolvable:$true] %s32_s12 }
  0x14   :  { %p5598_p9 = scmp.lt.u32.totalorder %s5594_s15, %s6820_s2 }
  0x16   :  { %p5600_p10 = pnand %p5598_p9, %p5595_p8 }
  0x18   :  { %5603 = shalt.err (!%p5600_p10)
}
  0x19   :  { %s5604_s20 = scalar_lea.vmem %s33_s12, 15360  ;;  %p5609_p12 = scmp.lt.s32.totalorder %s33_s12, %s33_s12 }
  0x1a   :  { %p5605_p11 = scmp.ne.s32.totalorder %s33_s12, %s5604_s20  ;;  %p5610_p13 = scmp.lt.s32.totalorder %s5604_s20, %s5604_s20 }
  0x1c   :  { %p5611_p0 = por %p5610_p13, %p5609_p12 }
  0x1e   :  { %p5612_p1 = pnand %p5611_p0, %p5605_p11 }
  0x20   :  { %5615 = shalt.err (!%p5612_p1)
}
  0x21   :  { %s5624_s1 = smov 320   ;;  %s5625_s21 = smov 20  }
  0x22   :  { %38 = dma.hbm_to_vmem [thread:$0]  %s6820_s2, 15360, %s33_s12, [#allocation5], %s5624_s1, %s5624_s1, %s5625_s21  }
  0x23   :  { %5616 = dma.done.wait [#allocation3], 3072  }
  0x24   :  { %5617 = vsyncadd [#allocation3], 4294964224 }
  0x25   :  { %5618 = dma.done.wait [#allocation5], 15360  }
  0x26   :  { %5619 = vsyncadd [#allocation5], 4294951936  ;;  %v5626_v0 = vmov 0.0   ;;  %v5627_v1 = vmov 0   ;;  %vm5628_vm0 = vmmov 0   ;;  %v4956_v25 = vld [vmem:[%s6818_s0] sm:$0xff]  }
  0x27   :  { %4790 = vmatprep.subr.bf16.mxu1 %v5626_v0  ;;  %269 = vmatprep.mubr.bf16.mxu0 %v5627_v1  ;;  %v4931_v2 = vld [vmem:[#allocation2 + $0x4] ss:$12 sps:$4 sm:$0xff]   ;;  %v4933_v3 = vld [vmem:[#allocation2] ss:$12 sps:$4 sm:$0xff]   ;;  %v4934_v4 = vld [vmem:[#allocation2 + $0x1c] ss:$12 sps:$4 sm:$0xff]  }
  0x28   :  { %4806 = vmatprep.mubr.msk.bf16.mxu1 %vm5628_vm0, %v5626_v0  ;;  %237 = vmatprep.subr.bf16.mxu0 %v4931_v2  ;;  %v4936_v5 = vld [vmem:[#allocation2 + $0x18] ss:$12 sps:$4 sm:$0xff]   ;;  %v4937_v6 = vld [vmem:[#allocation2 + $0x34] ss:$12 sps:$4 sm:$0xff]   ;;  %v4939_v7 = vld [vmem:[#allocation2 + $0x30] ss:$12 sps:$4 sm:$0xff]  }
  0x29   :  { %238 = vmatpush1.bf16.msra.mxu0 %v4933_v3  ;;  %v4940_v8 = vld [vmem:[#allocation2 + $0x4c] ss:$12 sps:$4 sm:$0xff]   ;;  %v4942_v9 = vld [vmem:[#allocation2 + $0x48] ss:$12 sps:$4 sm:$0xff]   ;;  %v4943_v11 = vld [vmem:[#allocation2 + $0x64] ss:$12 sps:$4 sm:$0xff]  }
  0x2a   :  { %239 = vmatprep.subr.bf16.mxu0 %v4934_v4  ;;  %v4955_v10 = vld [vmem:[#allocation2 + $0x8] ss:$12 sps:$4 sm:$0xff]   ;;  %v4957_v12 = vld [vmem:[#allocation2 + $0x20] ss:$12 sps:$4 sm:$0xff]   ;;  %v4958_v15 = vld [vmem:[#allocation2 + $0x38] ss:$12 sps:$4 sm:$0xff]  }
  0x2b   :  { %4791 = vmatpush3.bf16.msra.mxu1 %v4955_v10  ;;  %v4945_v13 = vld [vmem:[#allocation2 + $0x60] ss:$12 sps:$4 sm:$0xff]   ;;  %v4946_v14 = vld [vmem:[#allocation2 + $0x7c] ss:$12 sps:$4 sm:$0xff]   ;;  %v4948_v16 = vld [vmem:[#allocation2 + $0x78] ss:$12 sps:$4 sm:$0xff]  }
  0x2c   :  { %4792 = vmatprep.subr.bf16.mxu1 %v5626_v0  ;;  %v4949_v17 = vld [vmem:[#allocation2 + $0x94] ss:$12 sps:$4 sm:$0xff]   ;;  %v4959_v18 = vld [vmem:[#allocation2 + $0x50] ss:$12 sps:$4 sm:$0xff]   ;;  %v4952_v20 = vld [vmem:[#allocation2 + $0xac] ss:$12 sps:$4 sm:$0xff]  }
  0x2d   :  { %240 = vmatpush1.bf16.msra.mxu0 %v4936_v5  ;;  %v4951_v19 = vld [vmem:[#allocation2 + $0x90] ss:$12 sps:$4 sm:$0xff]   ;;  %v4960_v21 = vld [vmem:[#allocation2 + $0x68] ss:$12 sps:$4 sm:$0xff]   ;;  %v4966_v23 = vld [vmem:[#allocation4 + $0x4] ss:$20 sps:$4 sm:$0xff]  }
  0x2e   :  { %241 = vmatprep.subr.bf16.mxu0 %v4937_v6  ;;  %v4954_v22 = vld [vmem:[#allocation2 + $0xa8] ss:$12 sps:$4 sm:$0xff]   ;;  %v4961_v24 = vld [vmem:[#allocation2 + $0x80] ss:$12 sps:$4 sm:$0xff]   ;;  %v4962_v28 = vld [vmem:[#allocation2 + $0x98] ss:$12 sps:$4 sm:$0xff]  }
  0x2f   :  { %4793 = vmatpush3.bf16.msra.mxu1 %v4957_v12  ;;  %v4964_v26 = vld [vmem:[#allocation4] ss:$20 sps:$4 sm:$0xff]   ;;  %v4970_v29 = vld [vmem:[#allocation4 + $0x28] ss:$20 sps:$4 sm:$0xff]   ;;  %v4976_v33 = vld [vmem:[#allocation4 + $0x50] ss:$20 sps:$4 sm:$0xff]  }
  0x30   :  { %4794 = vmatprep.subr.bf16.mxu1 %v5626_v0  ;;  %v4972_v27 = vld [vmem:[#allocation4 + $0x2c] ss:$20 sps:$4 sm:$0xff]   ;;  %v4978_v30 = vld [vmem:[#allocation4 + $0x54] ss:$20 sps:$4 sm:$0xff]   ;;  %v4963_v31 = vld [vmem:[#allocation2 + $0xb0] ss:$12 sps:$4 sm:$0xff]  }
  0x31   :  { %242 = vmatpush1.bf16.msra.mxu0 %v4939_v7  ;;  %v4969_v32 = vld [vmem:[#allocation4 + $0xc] ss:$20 sps:$4 sm:$0xff]   ;;  %v4984_v34 = vld [vmem:[#allocation4 + $0x7c] ss:$20 sps:$4 sm:$0xff]   ;;  %v4975_v36 = vld [vmem:[#allocation4 + $0x34] ss:$20 sps:$4 sm:$0xff]  }
  0x32   :  { %243 = vmatprep.subr.bf16.mxu0 %v4940_v8  ;;  %v4967_v35 = vld [vmem:[#allocation4 + $0x8] ss:$20 sps:$4 sm:$0xff]   ;;  %v4982_v37 = vld [vmem:[#allocation4 + $0x78] ss:$20 sps:$4 sm:$0xff]   ;;  %v4973_v39 = vld [vmem:[#allocation4 + $0x30] ss:$20 sps:$4 sm:$0xff]  }
  0x33   :  { %4795 = vmatpush3.bf16.msra.mxu1 %v4958_v15  ;;  %v4990_v38 = vld [vmem:[#allocation4 + $0xa4] ss:$20 sps:$4 sm:$0xff]   ;;  %v4981_v40 = vld [vmem:[#allocation4 + $0x5c] ss:$20 sps:$4 sm:$0xff]   ;;  %v4988_v41 = vld [vmem:[#allocation4 + $0xa0] ss:$20 sps:$4 sm:$0xff]  }
  0x34   :  { %4796 = vmatprep.subr.bf16.mxu1 %v5626_v0  ;;  %v4996_v42 = vld [vmem:[#allocation4 + $0xcc] ss:$20 sps:$4 sm:$0xff]   ;;  %v4987_v44 = vld [vmem:[#allocation4 + $0x84] ss:$20 sps:$4 sm:$0xff]   ;;  %v4994_v45 = vld [vmem:[#allocation4 + $0xc8] ss:$20 sps:$4 sm:$0xff]  }
  0x35   :  { %244 = vmatpush1.bf16.msra.mxu0 %v4942_v9  ;;  %v4979_v43 = vld [vmem:[#allocation4 + $0x58] ss:$20 sps:$4 sm:$0xff]   ;;  %v5002_v46 = vld [vmem:[#allocation4 + $0xf4] ss:$20 sps:$4 sm:$0xff]   ;;  %v5000_v50 = vld [vmem:[#allocation4 + $0xf0] ss:$20 sps:$4 sm:$0xff]  }
  0x36   :  { %245 = vmatprep.subr.bf16.mxu0 %v4943_v11  ;;  %v4985_v47 = vld [vmem:[#allocation4 + $0x80] ss:$20 sps:$4 sm:$0xff]   ;;  %v4991_v49 = vld [vmem:[#allocation4 + $0xa8] ss:$20 sps:$4 sm:$0xff]   ;;  %v5006_v53 = vld [vmem:[#allocation4 + $0x118] ss:$20 sps:$4 sm:$0xff]  }
  0x37   :  { %4797 = vmatpush3.bf16.msra.mxu1 %v4959_v18  ;;  %v4993_v48 = vld [vmem:[#allocation4 + $0xac] ss:$20 sps:$4 sm:$0xff]   ;;  %v4999_v51 = vld [vmem:[#allocation4 + $0xd4] ss:$20 sps:$4 sm:$0xff]   ;;  %v5008_v52 = vld [vmem:[#allocation4 + $0x11c] ss:$20 sps:$4 sm:$0xff]  }
  0x38   :  { %4798 = vmatprep.subr.bf16.mxu1 %v5626_v0  ;;  %v5014_v54 = vld [vmem:[#allocation4 + $0x144] ss:$20 sps:$4 sm:$0xff]   ;;  %v5005_v56 = vld [vmem:[#allocation4 + $0xfc] ss:$20 sps:$4 sm:$0xff]   ;;  %v5012_v57 = vld [vmem:[#allocation4 + $0x140] ss:$20 sps:$4 sm:$0xff]  }
  0x39   :  { %246 = vmatpush1.bf16.msra.mxu0 %v4945_v13  ;;  %v4997_v55 = vld [vmem:[#allocation4 + $0xd0] ss:$20 sps:$4 sm:$0xff]   ;;  %v5020_v58 = vld [vmem:[#allocation4 + $0x16c] ss:$20 sps:$4 sm:$0xff]   ;;  %v5018_v61 = vld [vmem:[#allocation4 + $0x168] ss:$20 sps:$4 sm:$0xff]  }
  0x3a   :  { %247 = vmatprep.subr.bf16.mxu0 %v4946_v14  ;;  %v5003_v59 = vld [vmem:[#allocation4 + $0xf8] ss:$20 sps:$4 sm:$0xff]   ;;  %v5026_v62 = vld [vmem:[#allocation4 + $0x194] ss:$20 sps:$4 sm:$0xff]   ;;  %v5024_v3 = vld [vmem:[#allocation4 + $0x190] ss:$20 sps:$4 sm:$0xff]  }
  0x3b   :  { %4799 = vmatpush3.bf16.msra.mxu1 %v4960_v21  ;;  %v5011_v60 = vld [vmem:[#allocation4 + $0x124] ss:$20 sps:$4 sm:$0xff]   ;;  %v5009_v63 = vld [vmem:[#allocation4 + $0x120] ss:$20 sps:$4 sm:$0xff]   ;;  %v5032_v4 = vld [vmem:[#allocation4 + $0x1bc] ss:$20 sps:$4 sm:$0xff]  }
  0x3c   :  { %4800 = vmatprep.subr.bf16.mxu1 %v5626_v0  ;;  %v5017_v2 = vld [vmem:[#allocation4 + $0x14c] ss:$20 sps:$4 sm:$0xff]   ;;  %v5015_v5 = vld [vmem:[#allocation4 + $0x148] ss:$20 sps:$4 sm:$0xff]   ;;  %v5038_v8 = vld [vmem:[#allocation4 + $0x1e4] ss:$20 sps:$4 sm:$0xff]  }
  0x3d   :  { %248 = vmatpush1.bf16.msra.mxu0 %v4948_v16  ;;  %v5023_v6 = vld [vmem:[#allocation4 + $0x174] ss:$20 sps:$4 sm:$0xff]   ;;  %v5030_v7 = vld [vmem:[#allocation4 + $0x1b8] ss:$20 sps:$4 sm:$0xff]   ;;  %v5021_v9 = vld [vmem:[#allocation4 + $0x170] ss:$20 sps:$4 sm:$0xff]  }
  0x3e   :  { %249 = vmatprep.subr.bf16.mxu0 %v4949_v17  ;;  %v5029_v10 = vld [vmem:[#allocation4 + $0x19c] ss:$20 sps:$4 sm:$0xff]   ;;  %v5036_v11 = vld [vmem:[#allocation4 + $0x1e0] ss:$20 sps:$4 sm:$0xff]   ;;  %v5027_v13 = vld [vmem:[#allocation4 + $0x198] ss:$20 sps:$4 sm:$0xff]  }
  0x3f   :  { %4801 = vmatpush3.bf16.msra.mxu1 %v4961_v24  ;;  %v5044_v12 = vld [vmem:[#allocation4 + $0x20c] ss:$20 sps:$4 sm:$0xff]   ;;  %v5035_v14 = vld [vmem:[#allocation4 + $0x1c4] ss:$20 sps:$4 sm:$0xff]   ;;  %v5042_v15 = vld [vmem:[#allocation4 + $0x208] ss:$20 sps:$4 sm:$0xff]  }
  0x40   :  { %4802 = vmatprep.subr.bf16.mxu1 %v5626_v0  ;;  %v5033_v16 = vld [vmem:[#allocation4 + $0x1c0] ss:$20 sps:$4 sm:$0xff]   ;;  %v5039_v18 = vld [vmem:[#allocation4 + $0x1e8] ss:$20 sps:$4 sm:$0xff]   ;;  %v5051_v24 = vld [vmem:[#allocation4 + $0x238] ss:$20 sps:$4 sm:$0xff]  }
  0x41   :  { %250 = vmatpush1.bf16.msra.mxu0 %v4951_v19  ;;  %v5041_v17 = vld [vmem:[#allocation4 + $0x1ec] ss:$20 sps:$4 sm:$0xff]   ;;  %v5047_v19 = vld [vmem:[#allocation4 + $0x214] ss:$20 sps:$4 sm:$0xff]   ;;  %vm4168_vm1 = vcmask 523264  }
  0x42   :  { %251 = vmatprep.subr.bf16.mxu0 %v4952_v20  ;;  %v5045_v20 = vld [vmem:[#allocation4 + $0x210] ss:$20 sps:$4 sm:$0xff]   ;;  %v5050_v21 = vld [vmem:[#allocation4 + $0x234] ss:$20 sps:$4 sm:$0xff]  }
  0x43   :  { %4803 = vmatpush3.bf16.msra.mxu1 %v4962_v28  ;;  %v5057_v28 = vld [vmem:[#allocation4 + $0x260] ss:$20 sps:$4 sm:$0xff]  }
  0x44   :  { %4804 = vmatprep.subr.bf16.mxu1 %v5626_v0 }
  0x45   :  { %252 = vmatpush1.bf16.msra.mxu0 %v4954_v22  ;;  %v5053_v22 = vld [vmem:[#allocation4 + $0x23c] ss:$20 sps:$4 sm:$0xff]  }
  0x46   :  { %1125 = vmatprep.subr.bf16.mxu0 %v4966_v23  ;;  %v5048_v23 = vld [vmem:[#allocation4 + $0x230] ss:$20 sps:$4 sm:$0xff]  }
  0x47   :  { %4805 = vmatpush3.bf16.msra.mxu1 %v4963_v31  ;;  %v88_v31 = vlaneseq }
  0x48   :  { %270 = vmatmul.mubr.bf16.vlgmr.msra.gmra.mrb[0].mxu0 %v4956_v25  ;;  %1211 = vmatprep.subr.bf16.mxu1 %v4969_v32 }
  0x49   :  { %1126 = vmatpush1.bf16.msra.mxu0 %v4964_v26  ;;  %v5059_v26 = vld [vmem:[#allocation4 + $0x264] ss:$20 sps:$4 sm:$0xff]   ;;  %v5702_v32 = vshrl.u32 %v88_v31, 7 }
  0x4a   :  { %1127 = vmatprep.subr.bf16.mxu0 %v4972_v27  ;;  %4807 = vmatmul.mubr.bf16.vlgmr.msra.gmra.mrb[0].mxu1 %v4956_v25  ;;  %v5056_v25 = vld [vmem:[#allocation4 + $0x25c] ss:$20 sps:$4 sm:$0xff]   ;;  %v5054_v27 = vld [vmem:[#allocation4 + $0x258] ss:$20 sps:$4 sm:$0xff]  }
  0x4b   :  { %1212 = vmatpush1.bf16.msra.mxu1 %v4967_v35  ;;  %v5711_v35 = vsub.s32 1, %v5702_v32  ;;  %v5108_v31 = vld [vmem:[#allocation4 + $0x150] ss:$20 sps:$4 sm:$0xff]  }
  0x4c   :  { %1213 = vmatprep.subr.bf16.mxu1 %v4975_v36 }
  0x4d   :  { %1128 = vmatpush1.bf16.msra.mxu0 %v4970_v29  ;;  %v5062_v29 = vld [vmem:[#allocation4 + $0x284] ss:$20 sps:$4 sm:$0xff]  }
  0x4e   :  { %1129 = vmatprep.subr.bf16.mxu0 %v4978_v30  ;;  %v5065_v30 = vld [vmem:[#allocation4 + $0x28c] ss:$20 sps:$4 sm:$0xff]  }
  0x4f   :  { %1214 = vmatpush1.bf16.msra.mxu1 %v4973_v39 }
  0x50   :  { %1215 = vmatprep.subr.bf16.mxu1 %v4981_v40 }
  0x51   :  { %1130 = vmatpush1.bf16.msra.mxu0 %v4976_v33  ;;  %v86_v33 = vld [vmem:[%s6823_s5] sm:$0x7] }
  0x52   :  { %1131 = vmatprep.subr.bf16.mxu0 %v4984_v34  ;;  %v5708_v34 = vsub.s32 0, %v5702_v32 }
  0x53   :  { %1216 = vmatpush1.bf16.msra.mxu1 %v4979_v43 }
  0x54   :  { %1217 = vmatprep.subr.bf16.mxu1 %v4987_v44  ;;  %v91_v36 = vrot.slane %v86_v33, %v5708_v34 }
  0x55   :  { %1132 = vmatpush1.bf16.msra.mxu0 %v4982_v37  ;;  %v95_v37 = vrot.slane %v86_v33, %v5711_v35 }
  0x56   :  { %1133 = vmatprep.subr.bf16.mxu0 %v4990_v38 }
  0x57   :  { %1218 = vmatpush1.bf16.msra.mxu1 %v4985_v47 }
  0x58   :  { %1219 = vmatprep.subr.bf16.mxu1 %v4993_v48 }
  0x59   :  { %1134 = vmatpush1.bf16.msra.mxu0 %v4988_v41 }
  0x5a   :  { %1135 = vmatprep.subr.bf16.mxu0 %v4996_v42 }
  0x5b   :  { %1220 = vmatpush1.bf16.msra.mxu1 %v4991_v49 }
  0x5c   :  { %1221 = vmatprep.subr.bf16.mxu1 %v4999_v51  ;;  %v5060_v51 = vld [vmem:[#allocation4 + $0x280] ss:$20 sps:$4 sm:$0xff]  }
  0x5d   :  { %1136 = vmatpush1.bf16.msra.mxu0 %v4994_v45  ;;  %v5716_v45 = vsub.s32 2, %v5702_v32 }
  0x5e   :  { %1137 = vmatprep.subr.bf16.mxu0 %v5002_v46 }
  0x5f   :  { %1222 = vmatpush1.bf16.msra.mxu1 %v4997_v55  ;;  %v5071_v55 = vld [vmem:[#allocation4 + $0x2b4] ss:$20 sps:$4 sm:$0xff]  }
  0x60   :  { %1223 = vmatprep.subr.bf16.mxu1 %v5005_v56  ;;  %v99_v56 = vrot.slane %v86_v33, %v5716_v45  ;;  %v5109_v33 = vld [vmem:[#allocation4 + $0x10] ss:$20 sps:$4 sm:$0xff]  }
  0x61   :  { %1138 = vmatpush1.bf16.msra.mxu0 %v5000_v50 }
  0x62   :  { %1139 = vmatprep.subr.bf16.mxu0 %v5008_v52  ;;  %v5063_v52 = vld [vmem:[#allocation4 + $0x288] ss:$20 sps:$4 sm:$0xff]  }
  0x63   :  { %1224 = vmatpush1.bf16.msra.mxu1 %v5003_v59  ;;  %v5069_v59 = vld [vmem:[#allocation4 + $0x2b0] ss:$20 sps:$4 sm:$0xff]  }
  0x64   :  { %1225 = vmatprep.subr.bf16.mxu1 %v5011_v60 }
  0x65   :  { %1140 = vmatpush1.bf16.msra.mxu0 %v5006_v53 }
  0x66   :  { %1141 = vmatprep.subr.bf16.mxu0 %v5014_v54  ;;  %v5068_v54 = vld [vmem:[#allocation4 + $0x2ac] ss:$20 sps:$4 sm:$0xff]  }
  0x67   :  { %1226 = vmatpush1.bf16.msra.mxu1 %v5009_v63 }
  0x68   :  { %1227 = vmatprep.subr.bf16.mxu1 %v5017_v2 }
  0x69   :  { %1142 = vmatpush1.bf16.msra.mxu0 %v5012_v57 }
  0x6a   :  { %1143 = vmatprep.subr.bf16.mxu0 %v5020_v58  ;;  %v5066_v58 = vld [vmem:[#allocation4 + $0x2a8] ss:$20 sps:$4 sm:$0xff]  }
  0x6b   :  { %1228 = vmatpush1.bf16.msra.mxu1 %v5015_v5 }
  0x6c   :  { %1229 = vmatprep.subr.bf16.mxu1 %v5023_v6 }
  0x6d   :  { %1144 = vmatpush1.bf16.msra.mxu0 %v5018_v61  ;;  %v5074_v61 = vld [vmem:[#allocation4 + $0x2d4] ss:$20 sps:$4 sm:$0xff]  }
  0x6e   :  { %1145 = vmatprep.subr.bf16.mxu0 %v5026_v62  ;;  %v5077_v62 = vld [vmem:[#allocation4 + $0x2dc] ss:$20 sps:$4 sm:$0xff]  }
  0x6f   :  { %1230 = vmatpush1.bf16.msra.mxu1 %v5021_v9  ;;  %v5075_v9 = vld [vmem:[#allocation4 + $0x2d8] ss:$20 sps:$4 sm:$0xff]  }
  0x70   :  { %1231 = vmatprep.subr.bf16.mxu1 %v5029_v10  ;;  %v5080_v10 = vld [vmem:[#allocation4 + $0x2fc] ss:$20 sps:$4 sm:$0xff]  }
  0x71   :  { %1146 = vmatpush1.bf16.msra.mxu0 %v5024_v3 }
  0x72   :  { %1147 = vmatprep.subr.bf16.mxu0 %v5032_v4 }
  0x73   :  { %1232 = vmatpush1.bf16.msra.mxu1 %v5027_v13  ;;  %v5078_v13 = vld [vmem:[#allocation4 + $0x2f8] ss:$20 sps:$4 sm:$0xff]  }
  0x74   :  { %1233 = vmatprep.subr.bf16.mxu1 %v5035_v14  ;;  %v5081_v14 = vld [vmem:[#allocation4 + $0x300] ss:$20 sps:$4 sm:$0xff]  }
  0x75   :  { %1148 = vmatpush1.bf16.msra.mxu0 %v5030_v7 }
  0x76   :  { %1149 = vmatprep.subr.bf16.mxu0 %v5038_v8  ;;  %v5072_v8 = vld [vmem:[#allocation4 + $0x2d0] ss:$20 sps:$4 sm:$0xff]  }
  0x77   :  { %1234 = vmatpush1.bf16.msra.mxu1 %v5033_v16  ;;  %v5089_v16 = vld [vmem:[#allocation4 + $0x32c] ss:$20 sps:$4 sm:$0xff]  }
  0x78   :  { %1235 = vmatprep.subr.bf16.mxu1 %v5041_v17  ;;  %v5084_v17 = vld [vmem:[#allocation4 + $0x320] ss:$20 sps:$4 sm:$0xff]  }
  0x79   :  { %1150 = vmatpush1.bf16.msra.mxu0 %v5036_v11  ;;  %v5083_v11 = vld [vmem:[#allocation4 + $0x304] ss:$20 sps:$4 sm:$0xff]  }
  0x7a   :  { %1151 = vmatprep.subr.bf16.mxu0 %v5044_v12 }
  0x7b   :  { %1236 = vmatpush1.bf16.msra.mxu1 %v5039_v18  ;;  %v5087_v18 = vld [vmem:[#allocation4 + $0x328] ss:$20 sps:$4 sm:$0xff]  }
  0x7c   :  { %1237 = vmatprep.subr.bf16.mxu1 %v5047_v19  ;;  %v5092_v19 = vld [vmem:[#allocation4 + $0x34c] ss:$20 sps:$4 sm:$0xff]  }
  0x7d   :  { %1152 = vmatpush1.bf16.msra.mxu0 %v5042_v15  ;;  %v5086_v15 = vld [vmem:[#allocation4 + $0x324] ss:$20 sps:$4 sm:$0xff]  }
  0x7e   :  { %1153 = vmatprep.subr.bf16.mxu0 %v5050_v21  ;;  %v5090_v21 = vld [vmem:[#allocation4 + $0x348] ss:$20 sps:$4 sm:$0xff]  }
  0x7f   :  { %1238 = vmatpush1.bf16.msra.mxu1 %v5045_v20  ;;  %v5095_v20 = vld [vmem:[#allocation4 + $0x354] ss:$20 sps:$4 sm:$0xff]  }
  0x80   :  { %1239 = vmatprep.subr.bf16.mxu1 %v5053_v22  ;;  %v5093_v22 = vld [vmem:[#allocation4 + $0x350] ss:$20 sps:$4 sm:$0xff]  }
  0x81   :  { %1154 = vmatpush1.bf16.msra.mxu0 %v5048_v23  ;;  %v5098_v23 = vld [vmem:[#allocation4 + $0x374] ss:$20 sps:$4 sm:$0xff]  }
  0x82   :  { %1155 = vmatprep.subr.bf16.mxu0 %v5056_v25  ;;  %v5096_v25 = vld [vmem:[#allocation4 + $0x370] ss:$20 sps:$4 sm:$0xff]  }
  0x83   :  { %1240 = vmatpush1.bf16.msra.mxu1 %v5051_v24  ;;  %v5101_v24 = vld [vmem:[#allocation4 + $0x37c] ss:$20 sps:$4 sm:$0xff]  }
  0x84   :  { %1241 = vmatprep.subr.bf16.mxu1 %v5059_v26  ;;  %v5099_v26 = vld [vmem:[#allocation4 + $0x378] ss:$20 sps:$4 sm:$0xff]  }
  0x85   :  { %1156 = vmatpush1.bf16.msra.mxu0 %v5054_v27  ;;  %v5104_v27 = vld [vmem:[#allocation4 + $0x39c] ss:$20 sps:$4 sm:$0xff]  }
  0x86   :  { %1168 = vmatprep.subr.bf16.mxu0 %v5062_v29  ;;  %v5102_v29 = vld [vmem:[#allocation4 + $0x398] ss:$20 sps:$4 sm:$0xff]  }
  0x87   :  { %1242 = vmatpush1.bf16.msra.mxu1 %v5057_v28  ;;  %v5107_v28 = vld [vmem:[#allocation4 + $0x3a4] ss:$20 sps:$4 sm:$0xff]  }
  0x88   :  { %1254 = vmatprep.subr.bf16.mxu1 %v5065_v30  ;;  %v5105_v30 = vld [vmem:[#allocation4 + $0x3a0] ss:$20 sps:$4 sm:$0xff]  }
 0x11b   :  { %v271_v38 = vpop.f32.mrb[0].mxu0 }
 0x11c   :  { %v272_v39 = vadd.f32 %v271_v38, %v91_v36  ;;  %v273_v40 = vpop.f32.mrb[1].mxu0  ;;  %v5112_v38 = vld [vmem:[#allocation4 + $0x38] ss:$20 sps:$4 sm:$0xff]  }
 0x11d   :  { %v274_v41 = vadd.f32 %v273_v40, %v95_v37  ;;  %v275_v42 = vpop.f32.mrb[2].mxu0  ;;  %v314_v60 = vpop.f32.mrb[0].mxu1  ;;  %v5114_v40 = vld [vmem:[#allocation4 + $0x1a0] ss:$20 sps:$4 sm:$0xff]  }
 0x11e   :  { %v276_v43 = vadd.f32 %v275_v42, %v91_v36  ;;  %v277_v44 = vpop.f32.mrb[3].mxu0  ;;  %v321_v46 = vmax.f32 %v272_v39, 0.0  ;;  %v315_v63 = vadd.f32 %v314_v60, %v99_v56  ;;  %v4808_v2 = vpop.f32.mrb[1].mxu1  ;;  %v5110_v36 = vld [vmem:[#allocation4 + $0x290] ss:$20 sps:$4 sm:$0xff]  }
 0x11f   :  { %v278_v47 = vadd.f32 %v277_v44, %v95_v37  ;;  %v322_v49 = vmax.f32 %v274_v41, 0.0  ;;  %v317_v3 = vpop.f32.mrb[2].mxu1  ;;  %v5111_v37 = vld [vmem:[#allocation4 + $0x178] ss:$20 sps:$4 sm:$0xff]   ;;  %v5115_v41 = vld [vmem:[#allocation4 + $0x60] ss:$20 sps:$4 sm:$0xff]  }
 0x120   :  { %v324_v48 = vmax.f32 %v276_v43, 0.0  ;;  %v323_v4 = vmax.f32 %v315_v63, 0.0  ;;  %v318_v5 = vadd.f32 %v317_v3, %v99_v56  ;;  %v4809_v6 = vpop.f32.mrb[3].mxu1  ;;  %v5113_v39 = vld [vmem:[#allocation4 + $0x2b8] ss:$20 sps:$4 sm:$0xff]  }
 0x121   :  { %v325_v50 = vmax.f32 %v278_v47, 0.0  ;;  %v5116_v42 = vld [vmem:[#allocation4 + $0x2e0] ss:$20 sps:$4 sm:$0xff]   ;;  %v5117_v43 = vld [vmem:[#allocation4 + $0x1c8] ss:$20 sps:$4 sm:$0xff]  }
 0x122   :  { %v5718_v53 = vpack.c.bf16 %v324_v48, %v321_v46  ;;  %v326_v7 = vmax.f32 %v318_v5, 0.0  ;;  %v5118_v44 = vld [vmem:[#allocation4 + $0x88] ss:$20 sps:$4 sm:$0xff]   ;;  %v5120_v47 = vld [vmem:[#allocation4 + $0x1f0] ss:$20 sps:$4 sm:$0xff]  }
 0x123   :  { %v5721_v57 = vpack.c.bf16 %v325_v50, %v322_v49  ;;  %v5119_v46 = vld [vmem:[#allocation4 + $0x308] ss:$20 sps:$4 sm:$0xff]   ;;  %v5121_v48 = vld [vmem:[#allocation4 + $0xb0] ss:$20 sps:$4 sm:$0xff]   ;;  %v5123_v50 = vld [vmem:[#allocation4 + $0x218] ss:$20 sps:$4 sm:$0xff]  }
 0x124   :  { %v5729_v12 = vpack.c.bf16 %v326_v7, %v323_v4  ;;  %v5122_v49 = vld [vmem:[#allocation4 + $0x330] ss:$20 sps:$4 sm:$0xff]   ;;  %v5128_v56 = vld [vmem:[#allocation4 + $0x380] ss:$20 sps:$4 sm:$0xff]   ;;  %v5135_v63 = vld [vmem:[%s6821_s3 + $0x8] ss:$20 sps:$4 sm:$0xff]  }
 0x125   :  { %1157 = vmatprep.mubr.bf16.mxu0 %v5721_v57  ;;  %1243 = vmatprep.mubr.bf16.mxu1 %v5721_v57  ;;  %v5134_v60 = vld [vmem:[%s6821_s3 + $0x4] ss:$20 sps:$4 sm:$0xff]   ;;  %v5140_v2 = vld [vmem:[%s6821_s3 + $0x2c] ss:$20 sps:$4 sm:$0xff]   ;;  %v5143_v3 = vld [vmem:[%s6821_s3 + $0x34] ss:$20 sps:$4 sm:$0xff]  }
 0x126   :  { %1158 = vmatmul.mubr.bf16.vlgmr.msra.gmra.mrb[4].mxu0 %v5718_v53  ;;  %1244 = vmatmul.mubr.bf16.vlgmr.msra.gmra.mrb[4].mxu1 %v5718_v53  ;;  %v5138_v4 = vld [vmem:[%s6821_s3 + $0x28] ss:$20 sps:$4 sm:$0xff]   ;;  %v5141_v5 = vld [vmem:[%s6821_s3 + $0x30] ss:$20 sps:$4 sm:$0xff]  }
 0x127   :  { %1169 = vmatpush1.bf16.msra.mxu0 %v5060_v51  ;;  %1255 = vmatpush1.bf16.msra.mxu1 %v5063_v52  ;;  %v5124_v51 = vld [vmem:[#allocation4 + $0xd8] ss:$20 sps:$4 sm:$0xff]   ;;  %v5146_v6 = vld [vmem:[%s6821_s3 + $0x54] ss:$20 sps:$4 sm:$0xff]   ;;  %v5144_v7 = vld [vmem:[%s6821_s3 + $0x50] ss:$20 sps:$4 sm:$0xff]  }
 0x128   :  { %1170 = vmatprep.subr.bf16.mxu0 %v5068_v54  ;;  %1256 = vmatprep.subr.bf16.mxu1 %v5071_v55  ;;  %v5125_v52 = vld [vmem:[#allocation4 + $0x358] ss:$20 sps:$4 sm:$0xff]   ;;  %v5126_v54 = vld [vmem:[#allocation4 + $0x240] ss:$20 sps:$4 sm:$0xff]  }
 0x129   :  { %1200 = vmatprep.mubr.bf16.mxu0 %v5627_v1  ;;  %1286 = vmatprep.mubr.bf16.mxu1 %v5627_v1  ;;  %v5127_v55 = vld [vmem:[#allocation4 + $0x100] ss:$20 sps:$4 sm:$0xff]  }
 0x12b   :  { %1171 = vmatpush1.bf16.msra.mxu0 %v5066_v58  ;;  %1257 = vmatpush1.bf16.msra.mxu1 %v5069_v59  ;;  %v5130_v58 = vld [vmem:[#allocation4 + $0x128] ss:$20 sps:$4 sm:$0xff]  }
 0x12c   :  { %1172 = vmatprep.subr.bf16.mxu0 %v5074_v61  ;;  %1258 = vmatprep.subr.bf16.mxu1 %v5077_v62  ;;  %v5131_v59 = vld [vmem:[#allocation4 + $0x3a8] ss:$20 sps:$4 sm:$0xff]   ;;  %v5137_v61 = vld [vmem:[%s6821_s3 + $0xc] ss:$20 sps:$4 sm:$0xff]  }
 0x12d   :  { %v5132_v62 = vld [vmem:[%s6821_s3] ss:$20 sps:$4 sm:$0xff]  }
 0x12f   :  { %1173 = vmatpush1.bf16.msra.mxu0 %v5072_v8  ;;  %1259 = vmatpush1.bf16.msra.mxu1 %v5075_v9  ;;  %v5147_v8 = vld [vmem:[%s6821_s3 + $0x58] ss:$20 sps:$4 sm:$0xff]   ;;  %v5152_v9 = vld [vmem:[%s6821_s3 + $0x7c] ss:$20 sps:$4 sm:$0xff]  }
 0x130   :  { %1174 = vmatprep.subr.bf16.mxu0 %v5080_v10  ;;  %1260 = vmatprep.subr.bf16.mxu1 %v5083_v11  ;;  %v5155_v10 = vld [vmem:[%s6821_s3 + $0x84] ss:$20 sps:$4 sm:$0xff]  }
 0x131   :  { %v5150_v11 = vld [vmem:[%s6821_s3 + $0x78] ss:$20 sps:$4 sm:$0xff]  }
 0x133   :  { %1175 = vmatpush1.bf16.msra.mxu0 %v5078_v13  ;;  %1261 = vmatpush1.bf16.msra.mxu1 %v5081_v14  ;;  %v5158_v13 = vld [vmem:[%s6821_s3 + $0xa4] ss:$20 sps:$4 sm:$0xff]   ;;  %v5161_v14 = vld [vmem:[%s6821_s3 + $0xac] ss:$20 sps:$4 sm:$0xff]  }
 0x134   :  { %1176 = vmatprep.subr.bf16.mxu0 %v5086_v15  ;;  %1262 = vmatprep.subr.bf16.mxu1 %v5089_v16  ;;  %v5156_v15 = vld [vmem:[%s6821_s3 + $0xa0] ss:$20 sps:$4 sm:$0xff]   ;;  %v5159_v16 = vld [vmem:[%s6821_s3 + $0xa8] ss:$20 sps:$4 sm:$0xff]  }
 0x137   :  { %1177 = vmatpush1.bf16.msra.mxu0 %v5084_v17  ;;  %1263 = vmatpush1.bf16.msra.mxu1 %v5087_v18  ;;  %v5164_v17 = vld [vmem:[%s6821_s3 + $0xcc] ss:$20 sps:$4 sm:$0xff]   ;;  %v5167_v18 = vld [vmem:[%s6821_s3 + $0xd4] ss:$20 sps:$4 sm:$0xff]  }
 0x138   :  { %1178 = vmatprep.subr.bf16.mxu0 %v5092_v19  ;;  %1264 = vmatprep.subr.bf16.mxu1 %v5095_v20  ;;  %v5162_v19 = vld [vmem:[%s6821_s3 + $0xc8] ss:$20 sps:$4 sm:$0xff]   ;;  %v5165_v20 = vld [vmem:[%s6821_s3 + $0xd0] ss:$20 sps:$4 sm:$0xff]  }
 0x13b   :  { %1179 = vmatpush1.bf16.msra.mxu0 %v5090_v21  ;;  %1265 = vmatpush1.bf16.msra.mxu1 %v5093_v22  ;;  %v5170_v21 = vld [vmem:[%s6821_s3 + $0xf4] ss:$20 sps:$4 sm:$0xff]   ;;  %v5173_v22 = vld [vmem:[%s6821_s3 + $0xfc] ss:$20 sps:$4 sm:$0xff]  }
 0x13c   :  { %1180 = vmatprep.subr.bf16.mxu0 %v5098_v23  ;;  %1266 = vmatprep.subr.bf16.mxu1 %v5101_v24  ;;  %v5168_v23 = vld [vmem:[%s6821_s3 + $0xf0] ss:$20 sps:$4 sm:$0xff]   ;;  %v5171_v24 = vld [vmem:[%s6821_s3 + $0xf8] ss:$20 sps:$4 sm:$0xff]  }
 0x13f   :  { %1181 = vmatpush1.bf16.msra.mxu0 %v5096_v25  ;;  %1267 = vmatpush1.bf16.msra.mxu1 %v5099_v26  ;;  %v5176_v25 = vld [vmem:[%s6821_s3 + $0x11c] ss:$20 sps:$4 sm:$0xff]   ;;  %v5179_v26 = vld [vmem:[%s6821_s3 + $0x124] ss:$20 sps:$4 sm:$0xff]  }
 0x140   :  { %1182 = vmatprep.subr.bf16.mxu0 %v5104_v27  ;;  %1268 = vmatprep.subr.bf16.mxu1 %v5107_v28  ;;  %v5174_v27 = vld [vmem:[%s6821_s3 + $0x118] ss:$20 sps:$4 sm:$0xff]   ;;  %v5177_v28 = vld [vmem:[%s6821_s3 + $0x120] ss:$20 sps:$4 sm:$0xff]  }
 0x143   :  { %1183 = vmatpush1.bf16.msra.mxu0 %v5102_v29  ;;  %1269 = vmatpush1.bf16.msra.mxu1 %v5105_v30  ;;  %v5182_v29 = vld [vmem:[%s6821_s3 + $0x144] ss:$20 sps:$4 sm:$0xff]   ;;  %v5185_v30 = vld [vmem:[%s6821_s3 + $0x14c] ss:$20 sps:$4 sm:$0xff]  }
 0x144   :  { %4653 = vmatprep.subr.bf16.mxu0 %v5108_v31  ;;  %4810 = vmatprep.subr.bf16.mxu1 %v5626_v0  ;;  %v5180_v31 = vld [vmem:[%s6821_s3 + $0x140] ss:$20 sps:$4 sm:$0xff]  }
 0x146   :  { %1201 = vmatmul.mubr.bf16.vlgmr.msra.gmra.mrb[4].mxu0 %v5729_v12  ;;  %1287 = vmatmul.mubr.bf16.vlgmr.msra.gmra.mrb[4].mxu1 %v5729_v12 }
 0x147   :  { %4654 = vmatpush3.bf16.msra.mxu0 %v5109_v33  ;;  %1329 = vmatprep.mubr.bf16.mxu0 %v5721_v57  ;;  %v5129_v57 = vld [vmem:[#allocation4 + $0x268] ss:$20 sps:$4 sm:$0xff]  }
 0x148   :  { %4811 = vmatpush3.bf16.msra.mxu1 %v5110_v36  ;;  %4655 = vmatprep.subr.bf16.mxu0 %v5111_v37  ;;  %v5183_v33 = vld [vmem:[%s6821_s3 + $0x148] ss:$20 sps:$4 sm:$0xff]   ;;  %v5188_v36 = vld [vmem:[%s6821_s3 + $0x16c] ss:$20 sps:$4 sm:$0xff]  }
 0x149   :  { %4812 = vmatprep.subr.bf16.mxu1 %v5626_v0  ;;  %4826 = vmatprep.mubr.msk.bf16.mxu1 %vm5628_vm0, %v5626_v0  ;;  %v5191_v37 = vld [vmem:[%s6821_s3 + $0x174] ss:$20 sps:$4 sm:$0xff]  }
 0x14b   :  { %4656 = vmatpush3.bf16.msra.mxu0 %v5112_v38  ;;  %v5186_v38 = vld [vmem:[%s6821_s3 + $0x168] ss:$20 sps:$4 sm:$0xff]  }
 0x14c   :  { %4813 = vmatpush3.bf16.msra.mxu1 %v5113_v39  ;;  %4657 = vmatprep.subr.bf16.mxu0 %v5114_v40  ;;  %v5189_v39 = vld [vmem:[%s6821_s3 + $0x170] ss:$20 sps:$4 sm:$0xff]   ;;  %v5194_v40 = vld [vmem:[%s6821_s3 + $0x194] ss:$20 sps:$4 sm:$0xff]  }
 0x14d   :  { %4814 = vmatprep.subr.bf16.mxu1 %v5626_v0 }
 0x14f   :  { %4658 = vmatpush3.bf16.msra.mxu0 %v5115_v41  ;;  %v5197_v41 = vld [vmem:[%s6821_s3 + $0x19c] ss:$20 sps:$4 sm:$0xff]  }
 0x150   :  { %4815 = vmatpush3.bf16.msra.mxu1 %v5116_v42  ;;  %4659 = vmatprep.subr.bf16.mxu0 %v5117_v43  ;;  %v5192_v42 = vld [vmem:[%s6821_s3 + $0x190] ss:$20 sps:$4 sm:$0xff]   ;;  %v5195_v43 = vld [vmem:[%s6821_s3 + $0x198] ss:$20 sps:$4 sm:$0xff]  }
 0x151   :  { %4816 = vmatprep.subr.bf16.mxu1 %v5626_v0 }
 0x153   :  { %4660 = vmatpush3.bf16.msra.mxu0 %v5118_v44  ;;  %v5200_v44 = vld [vmem:[%s6821_s3 + $0x1bc] ss:$20 sps:$4 sm:$0xff]  }
 0x154   :  { %4817 = vmatpush3.bf16.msra.mxu1 %v5119_v46  ;;  %4661 = vmatprep.subr.bf16.mxu0 %v5120_v47  ;;  %v5203_v46 = vld [vmem:[%s6821_s3 + $0x1c4] ss:$20 sps:$4 sm:$0xff]  }
 0x155   :  { %4818 = vmatprep.subr.bf16.mxu1 %v5626_v0  ;;  %v5198_v47 = vld [vmem:[%s6821_s3 + $0x1b8] ss:$20 sps:$4 sm:$0xff]  }
 0x157   :  { %4662 = vmatpush3.bf16.msra.mxu0 %v5121_v48  ;;  %v5201_v48 = vld [vmem:[%s6821_s3 + $0x1c0] ss:$20 sps:$4 sm:$0xff]  }
 0x158   :  { %4819 = vmatpush3.bf16.msra.mxu1 %v5122_v49  ;;  %4663 = vmatprep.subr.bf16.mxu0 %v5123_v50  ;;  %v5206_v49 = vld [vmem:[%s6821_s3 + $0x1e4] ss:$20 sps:$4 sm:$0xff]   ;;  %v5209_v50 = vld [vmem:[%s6821_s3 + $0x1ec] ss:$20 sps:$4 sm:$0xff]  }
 0x159   :  { %4820 = vmatprep.subr.bf16.mxu1 %v5626_v0 }
 0x15b   :  { %4664 = vmatpush3.bf16.msra.mxu0 %v5124_v51  ;;  %v5204_v51 = vld [vmem:[%s6821_s3 + $0x1e0] ss:$20 sps:$4 sm:$0xff]  }
 0x15c   :  { %4821 = vmatpush3.bf16.msra.mxu1 %v5125_v52  ;;  %4665 = vmatprep.subr.bf16.mxu0 %v5126_v54  ;;  %v5207_v52 = vld [vmem:[%s6821_s3 + $0x1e8] ss:$20 sps:$4 sm:$0xff]   ;;  %v5212_v54 = vld [vmem:[%s6821_s3 + $0x20c] ss:$20 sps:$4 sm:$0xff]  }
 0x15d   :  { %4822 = vmatprep.subr.bf16.mxu1 %v5626_v0 }
 0x15f   :  { %4666 = vmatpush3.bf16.msra.mxu0 %v5127_v55  ;;  %v5215_v55 = vld [vmem:[%s6821_s3 + $0x214] ss:$20 sps:$4 sm:$0xff]  }
 0x160   :  { %4823 = vmatpush3.bf16.msra.mxu1 %v5128_v56  ;;  %4667 = vmatprep.subr.bf16.mxu0 %v5129_v57  ;;  %v5210_v56 = vld [vmem:[%s6821_s3 + $0x208] ss:$20 sps:$4 sm:$0xff]   ;;  %v5213_v57 = vld [vmem:[%s6821_s3 + $0x210] ss:$20 sps:$4 sm:$0xff]  }
 0x161   :  { %4824 = vmatprep.subr.bf16.mxu1 %v5626_v0 }
 0x163   :  { %4668 = vmatpush3.bf16.msra.mxu0 %v5130_v58  ;;  %v5218_v58 = vld [vmem:[%s6821_s3 + $0x234] ss:$20 sps:$4 sm:$0xff]  }
 0x164   :  { %4825 = vmatpush3.bf16.msra.mxu1 %v5131_v59  ;;  %2701 = vmatprep.subr.bf16.mxu0 %v5134_v60  ;;  %v5221_v59 = vld [vmem:[%s6821_s3 + $0x23c] ss:$20 sps:$4 sm:$0xff]  }
 0x165   :  { %2830 = vmatprep.subr.bf16.mxu1 %v5137_v61  ;;  %v5216_v60 = vld [vmem:[%s6821_s3 + $0x230] ss:$20 sps:$4 sm:$0xff]   ;;  %v5219_v61 = vld [vmem:[%s6821_s3 + $0x238] ss:$20 sps:$4 sm:$0xff]  }
 0x166   :  { %1330 = vmatmul.mubr.bf16.vlgmr.msra.gmra.mrb[8].mxu0 %v5718_v53  ;;  %v5149_v53 = vld [vmem:[%s6821_s3 + $0x5c] ss:$20 sps:$4 sm:$0xff]  }
 0x167   :  { %4827 = vmatmul.mubr.bf16.vlgmr.msra.gmra.mrb[8].mxu1 %v5729_v12  ;;  %2702 = vmatpush1.bf16.msra.mxu0 %v5132_v62  ;;  %v5153_v12 = vld [vmem:[%s6821_s3 + $0x80] ss:$20 sps:$4 sm:$0xff]   ;;  %v5224_v62 = vld [vmem:[%s6821_s3 + $0x25c] ss:$20 sps:$4 sm:$0xff]  }
 0x168   :  { %2831 = vmatpush1.bf16.msra.mxu1 %v5135_v63  ;;  %2703 = vmatprep.subr.bf16.mxu0 %v5140_v2  ;;  %v5227_v63 = vld [vmem:[%s6821_s3 + $0x264] ss:$20 sps:$4 sm:$0xff]  }
 0x169   :  { %2832 = vmatprep.subr.bf16.mxu1 %v5143_v3  ;;  %v5222_v2 = vld [vmem:[%s6821_s3 + $0x258] ss:$20 sps:$4 sm:$0xff]   ;;  %v5225_v3 = vld [vmem:[%s6821_s3 + $0x260] ss:$20 sps:$4 sm:$0xff]  }
 0x16b   :  { %2704 = vmatpush1.bf16.msra.mxu0 %v5138_v4  ;;  %v5230_v4 = vld [vmem:[%s6821_s3 + $0x284] ss:$20 sps:$4 sm:$0xff]  }
 0x16c   :  { %2833 = vmatpush1.bf16.msra.mxu1 %v5141_v5  ;;  %2705 = vmatprep.subr.bf16.mxu0 %v5146_v6  ;;  %v5233_v5 = vld [vmem:[%s6821_s3 + $0x28c] ss:$20 sps:$4 sm:$0xff]  }
 0x16d   :  { %2834 = vmatprep.subr.bf16.mxu1 %v5149_v53  ;;  %v5947_v6 = vld [vmem:[%s6823_s5 + $0x3] sm:$0x1f]  ;;  %v490_v53 = vsub.s32 3, %v5702_v32 }
 0x16f   :  { %2706 = vmatpush1.bf16.msra.mxu0 %v5144_v7  ;;  %v479_v7 = vrot.slane %v5947_v6, %v5708_v34 }
 0x170   :  { %2835 = vmatpush1.bf16.msra.mxu1 %v5147_v8  ;;  %2707 = vmatprep.subr.bf16.mxu0 %v5152_v9  ;;  %v487_v8 = vrot.slane %v5947_v6, %v5716_v45  ;;  %v483_v9 = vrot.slane %v5947_v6, %v5711_v35 }
 0x171   :  { %2836 = vmatprep.subr.bf16.mxu1 %v5155_v10  ;;  %v491_v10 = vrot.slane %v5947_v6, %v490_v53 }
 0x173   :  { %2708 = vmatpush1.bf16.msra.mxu0 %v5150_v11 }
 0x174   :  { %2837 = vmatpush1.bf16.msra.mxu1 %v5153_v12  ;;  %2709 = vmatprep.subr.bf16.mxu0 %v5158_v13 }
 0x175   :  { %2838 = vmatprep.subr.bf16.mxu1 %v5161_v14 }
 0x177   :  { %2710 = vmatpush1.bf16.msra.mxu0 %v5156_v15 }
 0x178   :  { %2839 = vmatpush1.bf16.msra.mxu1 %v5159_v16  ;;  %2711 = vmatprep.subr.bf16.mxu0 %v5164_v17 }
 0x179   :  { %2840 = vmatprep.subr.bf16.mxu1 %v5167_v18 }
 0x17b   :  { %2712 = vmatpush1.bf16.msra.mxu0 %v5162_v19 }
 0x17c   :  { %2841 = vmatpush1.bf16.msra.mxu1 %v5165_v20  ;;  %2713 = vmatprep.subr.bf16.mxu0 %v5170_v21 }
 0x17d   :  { %2842 = vmatprep.subr.bf16.mxu1 %v5173_v22 }
 0x17f   :  { %2714 = vmatpush1.bf16.msra.mxu0 %v5168_v23 }
 0x180   :  { %2843 = vmatpush1.bf16.msra.mxu1 %v5171_v24  ;;  %2715 = vmatprep.subr.bf16.mxu0 %v5176_v25 }
 0x181   :  { %2844 = vmatprep.subr.bf16.mxu1 %v5179_v26 }
 0x183   :  { %2716 = vmatpush1.bf16.msra.mxu0 %v5174_v27 }
 0x184   :  { %2845 = vmatpush1.bf16.msra.mxu1 %v5177_v28  ;;  %2717 = vmatprep.subr.bf16.mxu0 %v5182_v29 }
 0x185   :  { %2846 = vmatprep.subr.bf16.mxu1 %v5185_v30 }
 0x187   :  { %2718 = vmatpush1.bf16.msra.mxu0 %v5180_v31 }
 0x188   :  { %2847 = vmatpush1.bf16.msra.mxu1 %v5183_v33  ;;  %2719 = vmatprep.subr.bf16.mxu0 %v5188_v36 }
 0x189   :  { %2848 = vmatprep.subr.bf16.mxu1 %v5191_v37 }
 0x18b   :  { %2720 = vmatpush1.bf16.msra.mxu0 %v5186_v38 }
 0x18c   :  { %2849 = vmatpush1.bf16.msra.mxu1 %v5189_v39  ;;  %2721 = vmatprep.subr.bf16.mxu0 %v5194_v40 }
 0x18d   :  { %2850 = vmatprep.subr.bf16.mxu1 %v5197_v41 }
 0x18f   :  { %2722 = vmatpush1.bf16.msra.mxu0 %v5192_v42  ;;  %v5228_v42 = vld [vmem:[%s6821_s3 + $0x280] ss:$20 sps:$4 sm:$0xff]  }
 0x190   :  { %2851 = vmatpush1.bf16.msra.mxu1 %v5195_v43  ;;  %2723 = vmatprep.subr.bf16.mxu0 %v5200_v44  ;;  %v5231_v43 = vld [vmem:[%s6821_s3 + $0x288] ss:$20 sps:$4 sm:$0xff]   ;;  %v5236_v44 = vld [vmem:[%s6821_s3 + $0x2ac] ss:$20 sps:$4 sm:$0xff]  }
 0x191   :  { %2852 = vmatprep.subr.bf16.mxu1 %v5203_v46  ;;  %v5239_v46 = vld [vmem:[%s6821_s3 + $0x2b4] ss:$20 sps:$4 sm:$0xff]  }
 0x193   :  { %2724 = vmatpush1.bf16.msra.mxu0 %v5198_v47  ;;  %v5234_v47 = vld [vmem:[%s6821_s3 + $0x2a8] ss:$20 sps:$4 sm:$0xff]  }
 0x194   :  { %2853 = vmatpush1.bf16.msra.mxu1 %v5201_v48  ;;  %2725 = vmatprep.subr.bf16.mxu0 %v5206_v49  ;;  %v5237_v48 = vld [vmem:[%s6821_s3 + $0x2b0] ss:$20 sps:$4 sm:$0xff]   ;;  %v5242_v49 = vld [vmem:[%s6821_s3 + $0x2d4] ss:$20 sps:$4 sm:$0xff]  }
 0x195   :  { %2854 = vmatprep.subr.bf16.mxu1 %v5209_v50  ;;  %v5245_v50 = vld [vmem:[%s6821_s3 + $0x2dc] ss:$20 sps:$4 sm:$0xff]  }
 0x197   :  { %2726 = vmatpush1.bf16.msra.mxu0 %v5204_v51  ;;  %v5240_v51 = vld [vmem:[%s6821_s3 + $0x2d0] ss:$20 sps:$4 sm:$0xff]  }
 0x198   :  { %2855 = vmatpush1.bf16.msra.mxu1 %v5207_v52  ;;  %2727 = vmatprep.subr.bf16.mxu0 %v5212_v54  ;;  %v5243_v52 = vld [vmem:[%s6821_s3 + $0x2d8] ss:$20 sps:$4 sm:$0xff]   ;;  %v5248_v54 = vld [vmem:[%s6821_s3 + $0x2fc] ss:$20 sps:$4 sm:$0xff]  }
 0x199   :  { %2856 = vmatprep.subr.bf16.mxu1 %v5215_v55  ;;  %v5251_v55 = vld [vmem:[%s6821_s3 + $0x304] ss:$20 sps:$4 sm:$0xff]  }
 0x19b   :  { %2728 = vmatpush1.bf16.msra.mxu0 %v5210_v56  ;;  %v5246_v56 = vld [vmem:[%s6821_s3 + $0x2f8] ss:$20 sps:$4 sm:$0xff]  }
 0x19c   :  { %2857 = vmatpush1.bf16.msra.mxu1 %v5213_v57  ;;  %2729 = vmatprep.subr.bf16.mxu0 %v5218_v58  ;;  %v5249_v57 = vld [vmem:[%s6821_s3 + $0x300] ss:$20 sps:$4 sm:$0xff]   ;;  %v5254_v58 = vld [vmem:[%s6821_s3 + $0x324] ss:$20 sps:$4 sm:$0xff]  }
 0x19d   :  { %2858 = vmatprep.subr.bf16.mxu1 %v5221_v59  ;;  %v5257_v59 = vld [vmem:[%s6821_s3 + $0x32c] ss:$20 sps:$4 sm:$0xff]  }
 0x19f   :  { %2730 = vmatpush1.bf16.msra.mxu0 %v5216_v60  ;;  %v5252_v60 = vld [vmem:[%s6821_s3 + $0x320] ss:$20 sps:$4 sm:$0xff]  }
 0x1a0   :  { %2859 = vmatpush1.bf16.msra.mxu1 %v5219_v61  ;;  %2731 = vmatprep.subr.bf16.mxu0 %v5224_v62  ;;  %v5255_v61 = vld [vmem:[%s6821_s3 + $0x328] ss:$20 sps:$4 sm:$0xff]   ;;  %v5260_v62 = vld [vmem:[%s6821_s3 + $0x34c] ss:$20 sps:$4 sm:$0xff]  }
 0x1a1   :  { %2860 = vmatprep.subr.bf16.mxu1 %v5227_v63  ;;  %v5263_v63 = vld [vmem:[%s6821_s3 + $0x354] ss:$20 sps:$4 sm:$0xff]  }
 0x1a3   :  { %2732 = vmatpush1.bf16.msra.mxu0 %v5222_v2  ;;  %v5258_v2 = vld [vmem:[%s6821_s3 + $0x348] ss:$20 sps:$4 sm:$0xff]  }
 0x1a4   :  { %2861 = vmatpush1.bf16.msra.mxu1 %v5225_v3  ;;  %2744 = vmatprep.subr.bf16.mxu0 %v5230_v4  ;;  %v5261_v3 = vld [vmem:[%s6821_s3 + $0x350] ss:$20 sps:$4 sm:$0xff]   ;;  %v494_v4 = vsub.s32 4, %v5702_v32 }
 0x1a5   :  { %2873 = vmatprep.subr.bf16.mxu1 %v5233_v5  ;;  %v5266_v5 = vld [vmem:[%s6821_s3 + $0x374] ss:$20 sps:$4 sm:$0xff]   ;;  %v5514_v32 = vld [vmem:[%s6822_s4 + $0x2f0] ss:$12 sps:$4 sm:$0xff]  }
 0x219   :  { %v1202_v11 = vpop.f32.mrb[4].mxu0  ;;  %v1288_v12 = vpop.f32.mrb[4].mxu1 }
 0x21a   :  { %v4870_v13 = vadd.f32 %v1202_v11, %v479_v7  ;;  %v4874_v14 = vadd.f32 %v1288_v12, %v487_v8  ;;  %v1204_v15 = vpop.f32.mrb[5].mxu0  ;;  %v1290_v16 = vpop.f32.mrb[5].mxu1  ;;  %v5267_v11 = vld [vmem:[%s6821_s3 + $0x378] ss:$20 sps:$4 sm:$0xff]  }
 0x21b   :  { %v4871_v17 = vadd.f32 %v1204_v15, %v483_v9  ;;  %v4875_v18 = vadd.f32 %v1290_v16, %v491_v10  ;;  %v1206_v19 = vpop.f32.mrb[6].mxu0  ;;  %v1292_v20 = vpop.f32.mrb[6].mxu1 }
 0x21c   :  { %v4872_v21 = vadd.f32 %v1206_v19, %v479_v7  ;;  %v4876_v22 = vadd.f32 %v1292_v20, %v487_v8  ;;  %v1208_v23 = vpop.f32.mrb[7].mxu0  ;;  %v1294_v24 = vpop.f32.mrb[7].mxu1  ;;  %v1379_v27 = vmax.f32 %v4870_v13, 0.0  ;;  %v1381_v28 = vmax.f32 %v4874_v14, 0.0  ;;  %v5269_v7 = vld [vmem:[%s6821_s3 + $0x37c] ss:$20 sps:$4 sm:$0xff]  }
 0x21d   :  { %v4873_v25 = vadd.f32 %v1208_v23, %v483_v9  ;;  %v4877_v26 = vadd.f32 %v1294_v24, %v491_v10  ;;  %v1380_v31 = vmax.f32 %v4871_v17, 0.0  ;;  %v1382_v33 = vmax.f32 %v4875_v18, 0.0  ;;  %v5264_v10 = vld [vmem:[%s6821_s3 + $0x370] ss:$20 sps:$4 sm:$0xff]   ;;  %v5270_v23 = vld [vmem:[%s6821_s3 + $0x398] ss:$20 sps:$4 sm:$0xff]  }
 0x21e   :  { %v1384_v29 = vmax.f32 %v4872_v21, 0.0  ;;  %v1386_v30 = vmax.f32 %v4876_v22, 0.0  ;;  %v495_v9 = vrot.slane %v5947_v6, %v494_v4  ;;  %v5272_v14 = vld [vmem:[%s6821_s3 + $0x39c] ss:$20 sps:$4 sm:$0xff]   ;;  %v5275_v6 = vld [vmem:[%s6821_s3 + $0x3a4] ss:$20 sps:$4 sm:$0xff]  }
 0x21f   :  { %v1385_v36 = vmax.f32 %v4873_v25, 0.0  ;;  %v1387_v37 = vmax.f32 %v4877_v26, 0.0  ;;  %v5273_v24 = vld [vmem:[%s6821_s3 + $0x3a0] ss:$20 sps:$4 sm:$0xff]   ;;  %v5278_v25 = vld [vmem:[%s6821_s3 + $0x3c4] ss:$20 sps:$4 sm:$0xff]  }
 0x220   :  { %v5959_v38 = vpack.c.bf16 %v1384_v29, %v1379_v27  ;;  %v5961_v39 = vpack.c.bf16 %v1386_v30, %v1381_v28  ;;  %v5281_v26 = vld [vmem:[%s6821_s3 + $0x3cc] ss:$20 sps:$4 sm:$0xff]  }
 0x221   :  { %v5963_v40 = vpack.c.bf16 %v1385_v36, %v1380_v31  ;;  %v5965_v41 = vpack.c.bf16 %v1387_v37, %v1382_v33  ;;  %v5276_v30 = vld [vmem:[%s6821_s3 + $0x3c0] ss:$20 sps:$4 sm:$0xff]   ;;  %v5279_v31 = vld [vmem:[%s6821_s3 + $0x3c8] ss:$20 sps:$4 sm:$0xff]  }
 0x222   :  { %v5284_v33 = vld [vmem:[%s6821_s3 + $0x3ec] ss:$20 sps:$4 sm:$0xff]   ;;  %v5287_v36 = vld [vmem:[%s6821_s3 + $0x3f4] ss:$20 sps:$4 sm:$0xff]  }
 0x223   :  { %2733 = vmatprep.mubr.bf16.mxu0 %v5963_v40  ;;  %2862 = vmatprep.mubr.bf16.mxu1 %v5963_v40 }
 0x224   :  { %2734 = vmatmul.mubr.bf16.vlgmr.msra.gmra.mrb[12].mxu0 %v5959_v38  ;;  %2863 = vmatmul.mubr.bf16.vlgmr.msra.gmra.mrb[12].mxu1 %v5959_v38 }
 0x225   :  { %2745 = vmatpush1.bf16.msra.mxu0 %v5228_v42  ;;  %2874 = vmatpush1.bf16.msra.mxu1 %v5231_v43 }
 0x226   :  { %2776 = vmatprep.mubr.bf16.mxu0 %v5965_v41  ;;  %2905 = vmatprep.mubr.bf16.mxu1 %v5965_v41 }
 0x227   :  { %2746 = vmatprep.subr.bf16.mxu0 %v5236_v44  ;;  %2875 = vmatprep.subr.bf16.mxu1 %v5239_v46  ;;  %v5282_v44 = vld [vmem:[%s6821_s3 + $0x3e8] ss:$20 sps:$4 sm:$0xff]   ;;  %v5285_v46 = vld [vmem:[%s6821_s3 + $0x3f0] ss:$20 sps:$4 sm:$0xff]  }
 0x229   :  { %2747 = vmatpush1.bf16.msra.mxu0 %v5234_v47  ;;  %2876 = vmatpush1.bf16.msra.mxu1 %v5237_v48  ;;  %v5290_v47 = vld [vmem:[%s6821_s3 + $0x414] ss:$20 sps:$4 sm:$0xff]   ;;  %v5293_v48 = vld [vmem:[%s6821_s3 + $0x41c] ss:$20 sps:$4 sm:$0xff]  }
 0x22a   :  { %2748 = vmatprep.subr.bf16.mxu0 %v5242_v49  ;;  %2877 = vmatprep.subr.bf16.mxu1 %v5245_v50  ;;  %v5288_v49 = vld [vmem:[%s6821_s3 + $0x410] ss:$20 sps:$4 sm:$0xff]   ;;  %v5291_v50 = vld [vmem:[%s6821_s3 + $0x418] ss:$20 sps:$4 sm:$0xff]  }
 0x22d   :  { %2749 = vmatpush1.bf16.msra.mxu0 %v5240_v51  ;;  %2878 = vmatpush1.bf16.msra.mxu1 %v5243_v52  ;;  %v5296_v51 = vld [vmem:[%s6821_s3 + $0x43c] ss:$20 sps:$4 sm:$0xff]   ;;  %v5299_v52 = vld [vmem:[%s6821_s3 + $0x444] ss:$20 sps:$4 sm:$0xff]  }
 0x22e   :  { %2750 = vmatprep.subr.bf16.mxu0 %v5248_v54  ;;  %2879 = vmatprep.subr.bf16.mxu1 %v5251_v55  ;;  %v5294_v54 = vld [vmem:[%s6821_s3 + $0x438] ss:$20 sps:$4 sm:$0xff]   ;;  %v5297_v55 = vld [vmem:[%s6821_s3 + $0x440] ss:$20 sps:$4 sm:$0xff]  }
 0x231   :  { %2751 = vmatpush1.bf16.msra.mxu0 %v5246_v56  ;;  %2880 = vmatpush1.bf16.msra.mxu1 %v5249_v57  ;;  %v5302_v56 = vld [vmem:[%s6821_s3 + $0x464] ss:$20 sps:$4 sm:$0xff]   ;;  %v5305_v57 = vld [vmem:[%s6821_s3 + $0x46c] ss:$20 sps:$4 sm:$0xff]  }
 0x232   :  { %2752 = vmatprep.subr.bf16.mxu0 %v5254_v58  ;;  %2881 = vmatprep.subr.bf16.mxu1 %v5257_v59  ;;  %v5300_v58 = vld [vmem:[%s6821_s3 + $0x460] ss:$20 sps:$4 sm:$0xff]   ;;  %v5303_v59 = vld [vmem:[%s6821_s3 + $0x468] ss:$20 sps:$4 sm:$0xff]  }
 0x235   :  { %2753 = vmatpush1.bf16.msra.mxu0 %v5252_v60  ;;  %2882 = vmatpush1.bf16.msra.mxu1 %v5255_v61  ;;  %v5308_v60 = vld [vmem:[%s6821_s3 + $0x48c] ss:$20 sps:$4 sm:$0xff]   ;;  %v5311_v61 = vld [vmem:[%s6821_s3 + $0x494] ss:$20 sps:$4 sm:$0xff]  }
 0x236   :  { %2754 = vmatprep.subr.bf16.mxu0 %v5260_v62  ;;  %2883 = vmatprep.subr.bf16.mxu1 %v5263_v63  ;;  %v5306_v62 = vld [vmem:[%s6821_s3 + $0x488] ss:$20 sps:$4 sm:$0xff]   ;;  %v5309_v63 = vld [vmem:[%s6821_s3 + $0x490] ss:$20 sps:$4 sm:$0xff]  }
 0x239   :  { %2755 = vmatpush1.bf16.msra.mxu0 %v5258_v2  ;;  %2884 = vmatpush1.bf16.msra.mxu1 %v5261_v3  ;;  %v4669_v8 = vpop.f32.mrb[8].mxu0  ;;  %v5314_v2 = vld [vmem:[%s6821_s3 + $0x4b4] ss:$20 sps:$4 sm:$0xff]   ;;  %v5317_v3 = vld [vmem:[%s6821_s3 + $0x4bc] ss:$20 sps:$4 sm:$0xff]  }
 0x23a   :  { %v1372_v12 = vpop.f32.mrb[8].mxu1  ;;  %v4670_v13 = vpop.f32.mrb[9].mxu0  ;;  %2756 = vmatprep.subr.bf16.mxu0 %v5266_v5  ;;  %2885 = vmatprep.subr.bf16.mxu1 %v5269_v7  ;;  %v5312_v5 = vld [vmem:[%s6821_s3 + $0x4b0] ss:$20 sps:$4 sm:$0xff]   ;;  %v5315_v7 = vld [vmem:[%s6821_s3 + $0x4b8] ss:$20 sps:$4 sm:$0xff]  }
 0x23b   :  { %v4671_v15 = vadd.f32 %v4670_v13, %v4669_v8  ;;  %v4828_v16 = vpop.f32.mrb[9].mxu1  ;;  %v4672_v17 = vpop.f32.mrb[10].mxu0  ;;  %v5320_v8 = vld [vmem:[%s6821_s3 + $0x4dc] ss:$20 sps:$4 sm:$0xff]   ;;  %v5329_v13 = vld [vmem:[%s6821_s3 + $0x50c] ss:$20 sps:$4 sm:$0xff]  }
 0x23c   :  { %v1375_v18 = vpop.f32.mrb[10].mxu1  ;;  %v4673_v19 = vpop.f32.mrb[11].mxu0  ;;  %v5335_v16 = vld [vmem:[%s6821_s3 + $0x534] ss:$20 sps:$4 sm:$0xff]  }
 0x23d   :  { %v1332_v20 = vadd.f32 %v4671_v15, %v495_v9  ;;  %v4674_v21 = vadd.f32 %v4673_v19, %v4672_v17  ;;  %v4829_v22 = vpop.f32.mrb[11].mxu1  ;;  %2757 = vmatpush1.bf16.msra.mxu0 %v5264_v10  ;;  %2886 = vmatpush1.bf16.msra.mxu1 %v5267_v11  ;;  %v5318_v10 = vld [vmem:[%s6821_s3 + $0x4d8] ss:$20 sps:$4 sm:$0xff]   ;;  %v5321_v11 = vld [vmem:[%s6821_s3 + $0x4e0] ss:$20 sps:$4 sm:$0xff]  }
 0x23e   :  { %2758 = vmatprep.subr.bf16.mxu0 %v5272_v14  ;;  %2887 = vmatprep.subr.bf16.mxu1 %v5275_v6  ;;  %v5324_v14 = vld [vmem:[%s6821_s3 + $0x500] ss:$20 sps:$4 sm:$0xff]   ;;  %v5327_v6 = vld [vmem:[%s6821_s3 + $0x508] ss:$20 sps:$4 sm:$0xff]   ;;  %v5339_v22 = vld [vmem:[%s6821_s3 + $0x558] ss:$20 sps:$4 sm:$0xff]  }
 0x23f   :  { %v1373_v27 = vadd.f32 %v1372_v12, %v1332_v20  ;;  %v1335_v28 = vadd.f32 %v4674_v21, %v495_v9  ;;  %v5323_v9 = vld [vmem:[%s6821_s3 + $0x4e4] ss:$20 sps:$4 sm:$0xff]   ;;  %v5332_v15 = vld [vmem:[%s6821_s3 + $0x52c] ss:$20 sps:$4 sm:$0xff]   ;;  %v5330_v17 = vld [vmem:[%s6821_s3 + $0x528] ss:$20 sps:$4 sm:$0xff]  }
 0x240   :  { %v5326_v12 = vld [vmem:[%s6821_s3 + $0x504] ss:$20 sps:$4 sm:$0xff]   ;;  %v5338_v19 = vld [vmem:[%s6821_s3 + $0x554] ss:$20 sps:$4 sm:$0xff]   ;;  %v5341_v20 = vld [vmem:[%s6821_s3 + $0x55c] ss:$20 sps:$4 sm:$0xff]  }
 0x241   :  { %v1376_v29 = vadd.f32 %v1375_v18, %v1335_v28  ;;  %2759 = vmatpush1.bf16.msra.mxu0 %v5270_v23  ;;  %2888 = vmatpush1.bf16.msra.mxu1 %v5273_v24  ;;  %v1383_v37 = vmax.f32 %v1373_v27, 0.0  ;;  %v5333_v18 = vld [vmem:[%s6821_s3 + $0x530] ss:$20 sps:$4 sm:$0xff]   ;;  %v5353_v28 = vld [vmem:[%s6821_s3 + $0x5ac] ss:$20 sps:$4 sm:$0xff]  }
 0x242   :  { %2760 = vmatprep.subr.bf16.mxu0 %v5278_v25  ;;  %2889 = vmatprep.subr.bf16.mxu1 %v5281_v26  ;;  %v5336_v21 = vld [vmem:[%s6821_s3 + $0x550] ss:$20 sps:$4 sm:$0xff]   ;;  %v5342_v25 = vld [vmem:[%s6821_s3 + $0x578] ss:$20 sps:$4 sm:$0xff]   ;;  %v5345_v26 = vld [vmem:[%s6821_s3 + $0x580] ss:$20 sps:$4 sm:$0xff]  }
 0x243   :  { %v1388_v42 = vmax.f32 %v1376_v29, 0.0  ;;  %v5344_v23 = vld [vmem:[%s6821_s3 + $0x57c] ss:$20 sps:$4 sm:$0xff]   ;;  %v5347_v24 = vld [vmem:[%s6821_s3 + $0x584] ss:$20 sps:$4 sm:$0xff]  }
 0x244   :  { %v5350_v27 = vld [vmem:[%s6821_s3 + $0x5a4] ss:$20 sps:$4 sm:$0xff]   ;;  %v5348_v29 = vld [vmem:[%s6821_s3 + $0x5a0] ss:$20 sps:$4 sm:$0xff]  }
 0x245   :  { %v6085_v43 = vpack.c.bf16 %v1388_v42, %v1383_v37  ;;  %2761 = vmatpush1.bf16.msra.mxu0 %v5276_v30  ;;  %2890 = vmatpush1.bf16.msra.mxu1 %v5279_v31  ;;  %v5351_v30 = vld [vmem:[%s6821_s3 + $0x5a8] ss:$20 sps:$4 sm:$0xff]   ;;  %v5356_v31 = vld [vmem:[%s6821_s3 + $0x5cc] ss:$20 sps:$4 sm:$0xff]   ;;  %v5357_v37 = vld [vmem:[%s6821_s3 + $0x5d0] ss:$20 sps:$4 sm:$0xff]  }
 0x246   :  { %2762 = vmatprep.subr.bf16.mxu0 %v5284_v33  ;;  %2891 = vmatprep.subr.bf16.mxu1 %v5287_v36  ;;  %v5359_v33 = vld [vmem:[%s6821_s3 + $0x5d4] ss:$20 sps:$4 sm:$0xff]  }
 0x247   :  { %v5354_v36 = vld [vmem:[%s6821_s3 + $0x5c8] ss:$20 sps:$4 sm:$0xff]  }
 0x248   :  { %v5362_v42 = vld [vmem:[%s6821_s3 + $0x5f4] ss:$20 sps:$4 sm:$0xff]  }
 0x249   :  { %2763 = vmatpush1.bf16.msra.mxu0 %v5282_v44  ;;  %2892 = vmatpush1.bf16.msra.mxu1 %v5285_v46  ;;  %v5365_v44 = vld [vmem:[%s6821_s3 + $0x5fc] ss:$20 sps:$4 sm:$0xff]  }
 0x24a   :  { %2764 = vmatprep.subr.bf16.mxu0 %v5290_v47  ;;  %2893 = vmatprep.subr.bf16.mxu1 %v5293_v48  ;;  %v5360_v46 = vld [vmem:[%s6821_s3 + $0x5f0] ss:$20 sps:$4 sm:$0xff]   ;;  %v5363_v47 = vld [vmem:[%s6821_s3 + $0x5f8] ss:$20 sps:$4 sm:$0xff]  }
 0x24b   :  { %v5368_v48 = vld [vmem:[%s6821_s3 + $0x61c] ss:$20 sps:$4 sm:$0xff]  }
 0x24d   :  { %2765 = vmatpush1.bf16.msra.mxu0 %v5288_v49  ;;  %2894 = vmatpush1.bf16.msra.mxu1 %v5291_v50  ;;  %v5371_v49 = vld [vmem:[%s6821_s3 + $0x624] ss:$20 sps:$4 sm:$0xff]  }
 0x24e   :  { %2766 = vmatprep.subr.bf16.mxu0 %v5296_v51  ;;  %2895 = vmatprep.subr.bf16.mxu1 %v5299_v52  ;;  %v5366_v50 = vld [vmem:[%s6821_s3 + $0x618] ss:$20 sps:$4 sm:$0xff]   ;;  %v5369_v51 = vld [vmem:[%s6821_s3 + $0x620] ss:$20 sps:$4 sm:$0xff]   ;;  %v5372_v52 = vld [vmem:[%s6821_s3 + $0x150] ss:$20 sps:$4 sm:$0xff]  }
 0x251   :  { %2767 = vmatpush1.bf16.msra.mxu0 %v5294_v54  ;;  %2896 = vmatpush1.bf16.msra.mxu1 %v5297_v55  ;;  %v5373_v54 = vld [vmem:[%s6821_s3 + $0x3d0] ss:$20 sps:$4 sm:$0xff]  }
 0x252   :  { %2768 = vmatprep.subr.bf16.mxu0 %v5302_v56  ;;  %2897 = vmatprep.subr.bf16.mxu1 %v5305_v57  ;;  %v5374_v55 = vld [vmem:[%s6821_s3 + $0x10] ss:$20 sps:$4 sm:$0xff]   ;;  %v5376_v57 = vld [vmem:[%s6821_s3 + $0x178] ss:$20 sps:$4 sm:$0xff]  }
 0x253   :  { %v5375_v56 = vld [vmem:[%s6821_s3 + $0x290] ss:$20 sps:$4 sm:$0xff]  }
 0x255   :  { %2769 = vmatpush1.bf16.msra.mxu0 %v5300_v58  ;;  %2898 = vmatpush1.bf16.msra.mxu1 %v5303_v59  ;;  %v5377_v58 = vld [vmem:[%s6821_s3 + $0x3f8] ss:$20 sps:$4 sm:$0xff]  }
 0x256   :  { %2770 = vmatprep.subr.bf16.mxu0 %v5308_v60  ;;  %2899 = vmatprep.subr.bf16.mxu1 %v5311_v61  ;;  %v5378_v59 = vld [vmem:[%s6821_s3 + $0x38] ss:$20 sps:$4 sm:$0xff]   ;;  %v5380_v61 = vld [vmem:[%s6821_s3 + $0x1a0] ss:$20 sps:$4 sm:$0xff]  }
 0x257   :  { %v5379_v60 = vld [vmem:[%s6821_s3 + $0x2b8] ss:$20 sps:$4 sm:$0xff]  }
 0x259   :  { %2771 = vmatpush1.bf16.msra.mxu0 %v5306_v62  ;;  %2900 = vmatpush1.bf16.msra.mxu1 %v5309_v63  ;;  %v5382_v62 = vld [vmem:[%s6821_s3 + $0x60] ss:$20 sps:$4 sm:$0xff]   ;;  %v5384_v63 = vld [vmem:[%s6821_s3 + $0x1c8] ss:$20 sps:$4 sm:$0xff]  }
 0x25a   :  { %2772 = vmatprep.subr.bf16.mxu0 %v5314_v2  ;;  %2901 = vmatprep.subr.bf16.mxu1 %v5317_v3  ;;  %v5385_v2 = vld [vmem:[%s6821_s3 + $0x448] ss:$20 sps:$4 sm:$0xff]  }
 0x25b   :  { %v5386_v3 = vld [vmem:[%s6821_s3 + $0x88] ss:$20 sps:$4 sm:$0xff]  }
 0x25d   :  { %2773 = vmatpush1.bf16.msra.mxu0 %v5312_v5  ;;  %2902 = vmatpush1.bf16.msra.mxu1 %v5315_v7  ;;  %v5387_v5 = vld [vmem:[%s6821_s3 + $0x308] ss:$20 sps:$4 sm:$0xff]   ;;  %v5388_v7 = vld [vmem:[%s6821_s3 + $0x1f0] ss:$20 sps:$4 sm:$0xff]  }
 0x25e   :  { %2774 = vmatprep.subr.bf16.mxu0 %v5320_v8  ;;  %2903 = vmatprep.subr.bf16.mxu1 %v5323_v9  ;;  %v5389_v8 = vld [vmem:[%s6821_s3 + $0x470] ss:$20 sps:$4 sm:$0xff]  }
 0x25f   :  { %v5390_v9 = vld [vmem:[%s6821_s3 + $0xb0] ss:$20 sps:$4 sm:$0xff]  }
 0x261   :  { %2775 = vmatpush1.bf16.msra.mxu0 %v5318_v10  ;;  %2904 = vmatpush1.bf16.msra.mxu1 %v5321_v11  ;;  %v5391_v10 = vld [vmem:[%s6821_s3 + $0x330] ss:$20 sps:$4 sm:$0xff]   ;;  %v5392_v11 = vld [vmem:[%s6821_s3 + $0x218] ss:$20 sps:$4 sm:$0xff]  }
 0x262   :  { %2787 = vmatprep.subr.bf16.mxu0 %v5326_v12  ;;  %2916 = vmatprep.subr.bf16.mxu1 %v5329_v13  ;;  %v5393_v12 = vld [vmem:[%s6821_s3 + $0x498] ss:$20 sps:$4 sm:$0xff]  }
 0x263   :  { %v5394_v13 = vld [vmem:[%s6821_s3 + $0xd8] ss:$20 sps:$4 sm:$0xff]  }
 0x264   :  { %2777 = vmatmul.mubr.bf16.vlgmr.msra.gmra.mrb[12].mxu0 %v5961_v39  ;;  %2906 = vmatmul.mubr.bf16.vlgmr.msra.gmra.mrb[12].mxu1 %v5961_v39 }
 0x265   :  { %2788 = vmatpush1.bf16.msra.mxu0 %v5324_v14  ;;  %2917 = vmatpush1.bf16.msra.mxu1 %v5327_v6  ;;  %v5395_v14 = vld [vmem:[%s6821_s3 + $0x358] ss:$20 sps:$4 sm:$0xff]   ;;  %v5396_v6 = vld [vmem:[%s6821_s3 + $0x240] ss:$20 sps:$4 sm:$0xff]  }
 0x266   :  { %2789 = vmatprep.subr.bf16.mxu0 %v5332_v15  ;;  %2918 = vmatprep.subr.bf16.mxu1 %v5335_v16  ;;  %v5397_v15 = vld [vmem:[%s6821_s3 + $0x4c0] ss:$20 sps:$4 sm:$0xff]  }
 0x267   :  { %2819 = vmatprep.mubr.bf16.mxu0 %v5627_v1  ;;  %2948 = vmatprep.mubr.bf16.mxu1 %v5627_v1  ;;  %v5398_v16 = vld [vmem:[%s6821_s3 + $0x100] ss:$20 sps:$4 sm:$0xff]  }
 0x269   :  { %2790 = vmatpush1.bf16.msra.mxu0 %v5330_v17  ;;  %2919 = vmatpush1.bf16.msra.mxu1 %v5333_v18  ;;  %v5399_v17 = vld [vmem:[%s6821_s3 + $0x380] ss:$20 sps:$4 sm:$0xff]   ;;  %v5400_v18 = vld [vmem:[%s6821_s3 + $0x268] ss:$20 sps:$4 sm:$0xff]  }
 0x26a   :  { %2791 = vmatprep.subr.bf16.mxu0 %v5338_v19  ;;  %2920 = vmatprep.subr.bf16.mxu1 %v5341_v20  ;;  %v5401_v19 = vld [vmem:[%s6821_s3 + $0x4e8] ss:$20 sps:$4 sm:$0xff]  }
 0x26b   :  { %v5402_v20 = vld [vmem:[%s6821_s3 + $0x128] ss:$20 sps:$4 sm:$0xff]  }
 0x26d   :  { %2792 = vmatpush1.bf16.msra.mxu0 %v5336_v21  ;;  %2921 = vmatpush1.bf16.msra.mxu1 %v5339_v22  ;;  %v5403_v21 = vld [vmem:[%s6821_s3 + $0x3a8] ss:$20 sps:$4 sm:$0xff]   ;;  %v5414_v22 = vld [vmem:[%s6822_s4 + $0x4] ss:$12 sps:$4 sm:$0xff]  }
 0x26e   :  { %2793 = vmatprep.subr.bf16.mxu0 %v5344_v23  ;;  %2922 = vmatprep.subr.bf16.mxu1 %v5347_v24  ;;  %v5404_v23 = vld [vmem:[%s6821_s3 + $0x510] ss:$20 sps:$4 sm:$0xff]   ;;  %v5412_v24 = vld [vmem:[%s6822_s4] ss:$12 sps:$4 sm:$0xff]  }
 0x271   :  { %2794 = vmatpush1.bf16.msra.mxu0 %v5342_v25  ;;  %2923 = vmatpush1.bf16.msra.mxu1 %v5345_v26  ;;  %v5417_v25 = vld [vmem:[%s6822_s4 + $0x1c] ss:$12 sps:$4 sm:$0xff]   ;;  %v5405_v26 = vld [vmem:[%s6821_s3 + $0x538] ss:$20 sps:$4 sm:$0xff]  }
 0x272   :  { %2795 = vmatprep.subr.bf16.mxu0 %v5350_v27  ;;  %2924 = vmatprep.subr.bf16.mxu1 %v5353_v28  ;;  %v5406_v27 = vld [vmem:[%s6821_s3 + $0x560] ss:$20 sps:$4 sm:$0xff]   ;;  %v5418_v28 = vld [vmem:[%s6822_s4 + $0x30] ss:$12 sps:$4 sm:$0xff]  }
 0x275   :  { %2796 = vmatpush1.bf16.msra.mxu0 %v5348_v29  ;;  %2925 = vmatpush1.bf16.msra.mxu1 %v5351_v30  ;;  %v5423_v29 = vld [vmem:[%s6822_s4 + $0x4c] ss:$12 sps:$4 sm:$0xff]   ;;  %v5407_v30 = vld [vmem:[%s6821_s3 + $0x588] ss:$20 sps:$4 sm:$0xff]  }
 0x276   :  { %2797 = vmatprep.subr.bf16.mxu0 %v5356_v31  ;;  %2926 = vmatprep.subr.bf16.mxu1 %v5359_v33  ;;  %v5421_v31 = vld [vmem:[%s6822_s4 + $0x48] ss:$12 sps:$4 sm:$0xff]   ;;  %v5426_v33 = vld [vmem:[%s6822_s4 + $0x64] ss:$12 sps:$4 sm:$0xff]  }
 0x279   :  { %2798 = vmatpush1.bf16.msra.mxu0 %v5354_v36  ;;  %2927 = vmatpush1.bf16.msra.mxu1 %v5357_v37  ;;  %v5408_v36 = vld [vmem:[%s6821_s3 + $0x5b0] ss:$20 sps:$4 sm:$0xff]   ;;  %v5424_v37 = vld [vmem:[%s6822_s4 + $0x60] ss:$12 sps:$4 sm:$0xff]  }
 0x27a   :  { %2799 = vmatprep.subr.bf16.mxu0 %v5362_v42  ;;  %2928 = vmatprep.subr.bf16.mxu1 %v5365_v44  ;;  %v5429_v42 = vld [vmem:[%s6822_s4 + $0x7c] ss:$12 sps:$4 sm:$0xff]   ;;  %v5409_v44 = vld [vmem:[%s6821_s3 + $0x5d8] ss:$20 sps:$4 sm:$0xff]  }
 0x27d   :  { %2800 = vmatpush1.bf16.msra.mxu0 %v5360_v46  ;;  %2929 = vmatpush1.bf16.msra.mxu1 %v5363_v47  ;;  %v5427_v46 = vld [vmem:[%s6822_s4 + $0x78] ss:$12 sps:$4 sm:$0xff]   ;;  %v5432_v47 = vld [vmem:[%s6822_s4 + $0x94] ss:$12 sps:$4 sm:$0xff]  }
 0x27e   :  { %2801 = vmatprep.subr.bf16.mxu0 %v5368_v48  ;;  %2930 = vmatprep.subr.bf16.mxu1 %v5371_v49  ;;  %v5410_v48 = vld [vmem:[%s6821_s3 + $0x600] ss:$20 sps:$4 sm:$0xff]   ;;  %v5430_v49 = vld [vmem:[%s6822_s4 + $0x90] ss:$12 sps:$4 sm:$0xff]  }
 0x281   :  { %2802 = vmatpush1.bf16.msra.mxu0 %v5366_v50  ;;  %2931 = vmatpush1.bf16.msra.mxu1 %v5369_v51  ;;  %v5435_v50 = vld [vmem:[%s6822_s4 + $0xac] ss:$12 sps:$4 sm:$0xff]   ;;  %v5411_v51 = vld [vmem:[%s6821_s3 + $0x628] ss:$20 sps:$4 sm:$0xff]  }
 0x282   :  { %4684 = vmatprep.subr.bf16.mxu0 %v5372_v52  ;;  %4706 = vmatprep.subr.bf16.mxu1 %v5373_v54  ;;  %v5439_v52 = vld [vmem:[%s6822_s4 + $0xc8] ss:$12 sps:$4 sm:$0xff]  }
 0x283   :  { %v5433_v54 = vld [vmem:[%s6822_s4 + $0xa8] ss:$12 sps:$4 sm:$0xff]  }
 0x284   :  { %2820 = vmatmul.mubr.bf16.vlgmr.msra.gmra.mrb[12].mxu0 %v6085_v43  ;;  %2949 = vmatmul.mubr.bf16.vlgmr.msra.gmra.mrb[12].mxu1 %v6085_v43 }
 0x285   :  { %4685 = vmatpush3.bf16.msra.mxu0 %v5374_v55  ;;  %2991 = vmatprep.mubr.bf16.mxu0 %v5963_v40  ;;  %v5381_v40 = vld [vmem:[%s6821_s3 + $0x420] ss:$20 sps:$4 sm:$0xff]   ;;  %v5438_v55 = vld [vmem:[%s6822_s4 + $0xc4] ss:$12 sps:$4 sm:$0xff]  }
 0x286   :  { %4707 = vmatpush3.bf16.msra.mxu1 %v5375_v56  ;;  %3032 = vmatprep.mubr.bf16.mxu1 %v5965_v41  ;;  %v5383_v41 = vld [vmem:[%s6821_s3 + $0x2e0] ss:$20 sps:$4 sm:$0xff]  }
 0x287   :  { %4686 = vmatprep.subr.bf16.mxu0 %v5376_v57  ;;  %4708 = vmatprep.subr.bf16.mxu1 %v5377_v58  ;;  %v5440_v56 = vld [vmem:[%s6822_s4 + $0x8] ss:$12 sps:$4 sm:$0xff]   ;;  %v5444_v57 = vld [vmem:[%s6822_s4 + $0xe0] ss:$12 sps:$4 sm:$0xff]  }
 0x288   :  { %v5436_v58 = vld [vmem:[%s6822_s4 + $0xc0] ss:$12 sps:$4 sm:$0xff]  }
 0x289   :  { %4687 = vmatpush3.bf16.msra.mxu0 %v5378_v59  ;;  %v5443_v59 = vld [vmem:[%s6822_s4 + $0xdc] ss:$12 sps:$4 sm:$0xff]  }
 0x28a   :  { %4709 = vmatpush3.bf16.msra.mxu1 %v5379_v60  ;;  %4688 = vmatprep.subr.bf16.mxu0 %v5380_v61  ;;  %v5445_v60 = vld [vmem:[%s6822_s4 + $0x20] ss:$12 sps:$4 sm:$0xff]   ;;  %v5449_v61 = vld [vmem:[%s6822_s4 + $0xf8] ss:$12 sps:$4 sm:$0xff]  }
 0x28b   :  { %4710 = vmatprep.subr.bf16.mxu1 %v5381_v40  ;;  %v5448_v40 = vld [vmem:[%s6822_s4 + $0xf4] ss:$12 sps:$4 sm:$0xff]  }
 0x28d   :  { %4689 = vmatpush3.bf16.msra.mxu0 %v5382_v62  ;;  %v5450_v62 = vld [vmem:[%s6822_s4 + $0x38] ss:$12 sps:$4 sm:$0xff]  }
 0x28e   :  { %4711 = vmatpush3.bf16.msra.mxu1 %v5383_v41  ;;  %4690 = vmatprep.subr.bf16.mxu0 %v5384_v63  ;;  %v5454_v41 = vld [vmem:[%s6822_s4 + $0x110] ss:$12 sps:$4 sm:$0xff]  }
 0x28f   :  { %4712 = vmatprep.subr.bf16.mxu1 %v5385_v2  ;;  %v5446_v63 = vld [vmem:[%s6822_s4 + $0xf0] ss:$12 sps:$4 sm:$0xff]   ;;  %v5453_v2 = vld [vmem:[%s6822_s4 + $0x10c] ss:$12 sps:$4 sm:$0xff]  }
 0x291   :  { %4691 = vmatpush3.bf16.msra.mxu0 %v5386_v3  ;;  %v5455_v3 = vld [vmem:[%s6822_s4 + $0x50] ss:$12 sps:$4 sm:$0xff]  }
 0x292   :  { %4713 = vmatpush3.bf16.msra.mxu1 %v5387_v5  ;;  %4692 = vmatprep.subr.bf16.mxu0 %v5388_v7  ;;  %v5459_v5 = vld [vmem:[%s6822_s4 + $0x128] ss:$12 sps:$4 sm:$0xff]  }
 0x293   :  { %4714 = vmatprep.subr.bf16.mxu1 %v5389_v8  ;;  %v5451_v7 = vld [vmem:[%s6822_s4 + $0x108] ss:$12 sps:$4 sm:$0xff]   ;;  %v5458_v8 = vld [vmem:[%s6822_s4 + $0x124] ss:$12 sps:$4 sm:$0xff]  }
 0x295   :  { %4693 = vmatpush3.bf16.msra.mxu0 %v5390_v9  ;;  %v5460_v9 = vld [vmem:[%s6822_s4 + $0x68] ss:$12 sps:$4 sm:$0xff]  }
 0x296   :  { %4715 = vmatpush3.bf16.msra.mxu1 %v5391_v10  ;;  %4694 = vmatprep.subr.bf16.mxu0 %v5392_v11  ;;  %v5464_v10 = vld [vmem:[%s6822_s4 + $0x140] ss:$12 sps:$4 sm:$0xff]  }
 0x297   :  { %4716 = vmatprep.subr.bf16.mxu1 %v5393_v12  ;;  %v5456_v11 = vld [vmem:[%s6822_s4 + $0x120] ss:$12 sps:$4 sm:$0xff]   ;;  %v5463_v12 = vld [vmem:[%s6822_s4 + $0x13c] ss:$12 sps:$4 sm:$0xff]  }
 0x299   :  { %4695 = vmatpush3.bf16.msra.mxu0 %v5394_v13  ;;  %v5465_v13 = vld [vmem:[%s6822_s4 + $0x80] ss:$12 sps:$4 sm:$0xff]  }
 0x29a   :  { %4717 = vmatpush3.bf16.msra.mxu1 %v5395_v14  ;;  %4696 = vmatprep.subr.bf16.mxu0 %v5396_v6  ;;  %v5461_v14 = vld [vmem:[%s6822_s4 + $0x138] ss:$12 sps:$4 sm:$0xff]   ;;  %v5468_v6 = vld [vmem:[%s6822_s4 + $0x154] ss:$12 sps:$4 sm:$0xff]  }
 0x29b   :  { %4718 = vmatprep.subr.bf16.mxu1 %v5397_v15  ;;  %v5469_v15 = vld [vmem:[%s6822_s4 + $0x158] ss:$12 sps:$4 sm:$0xff]  }
 0x29d   :  { %4697 = vmatpush3.bf16.msra.mxu0 %v5398_v16  ;;  %v5470_v16 = vld [vmem:[%s6822_s4 + $0x98] ss:$12 sps:$4 sm:$0xff]  }
 0x29e   :  { %4719 = vmatpush3.bf16.msra.mxu1 %v5399_v17  ;;  %4698 = vmatprep.subr.bf16.mxu0 %v5400_v18  ;;  %v5466_v17 = vld [vmem:[%s6822_s4 + $0x150] ss:$12 sps:$4 sm:$0xff]   ;;  %v5473_v18 = vld [vmem:[%s6822_s4 + $0x16c] ss:$12 sps:$4 sm:$0xff]  }
 0x29f   :  { %4720 = vmatprep.subr.bf16.mxu1 %v5401_v19  ;;  %v5474_v19 = vld [vmem:[%s6822_s4 + $0x170] ss:$12 sps:$4 sm:$0xff]  }
 0x2a1   :  { %4699 = vmatpush3.bf16.msra.mxu0 %v5402_v20  ;;  %v5475_v20 = vld [vmem:[%s6822_s4 + $0xb0] ss:$12 sps:$4 sm:$0xff]  }
 0x2a2   :  { %4721 = vmatpush3.bf16.msra.mxu1 %v5403_v21  ;;  %4830 = vmatprep.subr.bf16.mxu0 %v5626_v0  ;;  %v5471_v21 = vld [vmem:[%s6822_s4 + $0x168] ss:$12 sps:$4 sm:$0xff]  }
 0x2a3   :  { %3914 = vmatprep.subr.bf16.mxu1 %v5414_v22  ;;  %v5478_v22 = vld [vmem:[%s6822_s4 + $0x184] ss:$12 sps:$4 sm:$0xff]  }
 0x2a4   :  { %2992 = vmatmul.mubr.bf16.vlgmr.msra.gmra.mrb[16].mxu0 %v5959_v38  ;;  %v5415_v38 = vld [vmem:[%s6822_s4 + $0x18] ss:$12 sps:$4 sm:$0xff]  }
 0x2a5   :  { %3033 = vmatmul.mubr.bf16.vlgmr.msra.gmra.mrb[16].mxu1 %v5961_v39  ;;  %4831 = vmatpush3.bf16.msra.mxu0 %v5404_v23  ;;  %v5420_v39 = vld [vmem:[%s6822_s4 + $0x34] ss:$12 sps:$4 sm:$0xff]  }
 0x2a6   :  { %4832 = vmatprep.subr.bf16.mxu0 %v5626_v0  ;;  %4846 = vmatprep.mubr.msk.bf16.mxu0 %vm5628_vm0, %v5626_v0  ;;  %v5479_v23 = vld [vmem:[%s6822_s4 + $0x248] ss:$12 sps:$4 sm:$0xff]  }
 0x2a7   :  { %3915 = vmatpush1.bf16.msra.mxu1 %v5412_v24  ;;  %v6555_v24 = vld [vmem:[%s6823_s5 + $0x8] sm:$0x1f] }
 0x2a8   :  { %3916 = vmatprep.subr.bf16.mxu1 %v5417_v25  ;;  %v1639_v25 = vrot.slane %v6555_v24, %v5708_v34 }
 0x2a9   :  { %4833 = vmatpush3.bf16.msra.mxu0 %v5405_v26  ;;  %v1647_v26 = vrot.slane %v6555_v24, %v5716_v45 }
 0x2aa   :  { %4834 = vmatprep.subr.bf16.mxu0 %v5626_v0 }
 0x2ab   :  { %3917 = vmatpush1.bf16.msra.mxu1 %v5415_v38  ;;  %v1643_v38 = vrot.slane %v6555_v24, %v5711_v35 }
 0x2ac   :  { %3918 = vmatprep.subr.bf16.mxu1 %v5420_v39  ;;  %v1651_v39 = vrot.slane %v6555_v24, %v490_v53 }
 0x2ad   :  { %4835 = vmatpush3.bf16.msra.mxu0 %v5406_v27 }
 0x2ae   :  { %4836 = vmatprep.subr.bf16.mxu0 %v5626_v0 }
 0x2af   :  { %3919 = vmatpush1.bf16.msra.mxu1 %v5418_v28 }
 0x2b0   :  { %3920 = vmatprep.subr.bf16.mxu1 %v5423_v29 }
 0x2b1   :  { %4837 = vmatpush3.bf16.msra.mxu0 %v5407_v30 }
 0x2b2   :  { %4838 = vmatprep.subr.bf16.mxu0 %v5626_v0 }
 0x2b3   :  { %3921 = vmatpush1.bf16.msra.mxu1 %v5421_v31 }
 0x2b4   :  { %3922 = vmatprep.subr.bf16.mxu1 %v5426_v33 }
 0x2b5   :  { %4839 = vmatpush3.bf16.msra.mxu0 %v5408_v36 }
 0x2b6   :  { %4840 = vmatprep.subr.bf16.mxu0 %v5626_v0 }
 0x2b7   :  { %3923 = vmatpush1.bf16.msra.mxu1 %v5424_v37 }
 0x2b8   :  { %3924 = vmatprep.subr.bf16.mxu1 %v5429_v42 }
 0x2b9   :  { %4841 = vmatpush3.bf16.msra.mxu0 %v5409_v44 }
 0x2ba   :  { %4842 = vmatprep.subr.bf16.mxu0 %v5626_v0 }
 0x2bb   :  { %3925 = vmatpush1.bf16.msra.mxu1 %v5427_v46 }
 0x2bc   :  { %3926 = vmatprep.subr.bf16.mxu1 %v5432_v47 }
 0x2bd   :  { %4843 = vmatpush3.bf16.msra.mxu0 %v5410_v48 }
 0x2be   :  { %4844 = vmatprep.subr.bf16.mxu0 %v5626_v0 }
 0x2bf   :  { %3927 = vmatpush1.bf16.msra.mxu1 %v5430_v49 }
 0x2c0   :  { %3928 = vmatprep.subr.bf16.mxu1 %v5435_v50 }
 0x2c1   :  { %4845 = vmatpush3.bf16.msra.mxu0 %v5411_v51 }
 0x2c2   :  { %4737 = vmatprep.subr.bf16.mxu0 %v5439_v52 }
 0x2c3   :  { %3929 = vmatpush1.bf16.msra.mxu1 %v5433_v54 }
 0x2c4   :  { %4847 = vmatmul.mubr.bf16.vlgmr.msra.gmra.mrb[20].mxu0 %v6085_v43  ;;  %3930 = vmatprep.subr.bf16.mxu1 %v5438_v55  ;;  %v5441_v43 = vld [vmem:[%s6822_s4 + $0xd8] ss:$12 sps:$4 sm:$0xff]  }
 0x2c5   :  { %4738 = vmatpush3.bf16.msra.mxu0 %v5440_v56 }
 0x2c6   :  { %4739 = vmatprep.subr.bf16.mxu0 %v5444_v57 }
 0x2c7   :  { %3931 = vmatpush1.bf16.msra.mxu1 %v5436_v58 }
 0x2c8   :  { %3932 = vmatprep.subr.bf16.mxu1 %v5443_v59 }
 0x2c9   :  { %4740 = vmatpush3.bf16.msra.mxu0 %v5445_v60 }
 0x2ca   :  { %4741 = vmatprep.subr.bf16.mxu0 %v5449_v61 }
 0x2cb   :  { %3933 = vmatpush1.bf16.msra.mxu1 %v5441_v43 }
 0x2cc   :  { %3934 = vmatprep.subr.bf16.mxu1 %v5448_v40 }
 0x2cd   :  { %4742 = vmatpush3.bf16.msra.mxu0 %v5450_v62  ;;  %v5476_v62 = vld [vmem:[%s6822_s4 + $0x180] ss:$12 sps:$4 sm:$0xff]  }
 0x2ce   :  { %4743 = vmatprep.subr.bf16.mxu0 %v5454_v41  ;;  %v5480_v41 = vld [vmem:[%s6822_s4 + $0x188] ss:$12 sps:$4 sm:$0xff]  }
 0x2cf   :  { %3935 = vmatpush1.bf16.msra.mxu1 %v5446_v63  ;;  %v5483_v63 = vld [vmem:[%s6822_s4 + $0x19c] ss:$12 sps:$4 sm:$0xff]  }
 0x2d0   :  { %3936 = vmatprep.subr.bf16.mxu1 %v5453_v2  ;;  %v5484_v2 = vld [vmem:[%s6822_s4 + $0x260] ss:$12 sps:$4 sm:$0xff]  }
 0x2d1   :  { %4744 = vmatpush3.bf16.msra.mxu0 %v5455_v3  ;;  %v5481_v3 = vld [vmem:[%s6822_s4 + $0x198] ss:$12 sps:$4 sm:$0xff]  }
 0x2d2   :  { %4745 = vmatprep.subr.bf16.mxu0 %v5459_v5  ;;  %v5485_v5 = vld [vmem:[%s6822_s4 + $0x1a0] ss:$12 sps:$4 sm:$0xff]  }
 0x2d3   :  { %3937 = vmatpush1.bf16.msra.mxu1 %v5451_v7  ;;  %v5488_v7 = vld [vmem:[%s6822_s4 + $0x1b4] ss:$12 sps:$4 sm:$0xff]  }
 0x2d4   :  { %3938 = vmatprep.subr.bf16.mxu1 %v5458_v8  ;;  %v5489_v8 = vld [vmem:[%s6822_s4 + $0x278] ss:$12 sps:$4 sm:$0xff]  }
 0x2d5   :  { %4746 = vmatpush3.bf16.msra.mxu0 %v5460_v9  ;;  %v5486_v9 = vld [vmem:[%s6822_s4 + $0x1b0] ss:$12 sps:$4 sm:$0xff]  }
 0x2d6   :  { %4747 = vmatprep.subr.bf16.mxu0 %v5464_v10  ;;  %v5490_v10 = vld [vmem:[%s6822_s4 + $0x1b8] ss:$12 sps:$4 sm:$0xff]  }
 0x2d7   :  { %3939 = vmatpush1.bf16.msra.mxu1 %v5456_v11  ;;  %v5493_v11 = vld [vmem:[%s6822_s4 + $0x1cc] ss:$12 sps:$4 sm:$0xff]  }
 0x2d8   :  { %3940 = vmatprep.subr.bf16.mxu1 %v5463_v12  ;;  %v5494_v12 = vld [vmem:[%s6822_s4 + $0x290] ss:$12 sps:$4 sm:$0xff]  }
 0x2d9   :  { %4748 = vmatpush3.bf16.msra.mxu0 %v5465_v13  ;;  %v5491_v13 = vld [vmem:[%s6822_s4 + $0x1c8] ss:$12 sps:$4 sm:$0xff]  }
 0x2da   :  { %4749 = vmatprep.subr.bf16.mxu0 %v5469_v15  ;;  %v5499_v15 = vld [vmem:[%s6822_s4 + $0x2a8] ss:$12 sps:$4 sm:$0xff]  }
 0x2db   :  { %3941 = vmatpush1.bf16.msra.mxu1 %v5461_v14  ;;  %v5495_v14 = vld [vmem:[%s6822_s4 + $0x1d0] ss:$12 sps:$4 sm:$0xff]  }
 0x2dc   :  { %3942 = vmatprep.subr.bf16.mxu1 %v5468_v6  ;;  %v5498_v6 = vld [vmem:[%s6822_s4 + $0x1e4] ss:$12 sps:$4 sm:$0xff]  }
 0x2dd   :  { %4750 = vmatpush3.bf16.msra.mxu0 %v5470_v16  ;;  %v5496_v16 = vld [vmem:[%s6822_s4 + $0x1e0] ss:$12 sps:$4 sm:$0xff]  }
 0x2de   :  { %4751 = vmatprep.subr.bf16.mxu0 %v5474_v19  ;;  %v5504_v19 = vld [vmem:[%s6822_s4 + $0x2c0] ss:$12 sps:$4 sm:$0xff]  }
 0x2df   :  { %3943 = vmatpush1.bf16.msra.mxu1 %v5466_v17  ;;  %v5500_v17 = vld [vmem:[%s6822_s4 + $0x1e8] ss:$12 sps:$4 sm:$0xff]  }
 0x2e0   :  { %3944 = vmatprep.subr.bf16.mxu1 %v5473_v18  ;;  %v5503_v18 = vld [vmem:[%s6822_s4 + $0x1fc] ss:$12 sps:$4 sm:$0xff]  }
 0x2e1   :  { %4752 = vmatpush3.bf16.msra.mxu0 %v5475_v20  ;;  %v5501_v20 = vld [vmem:[%s6822_s4 + $0x1f8] ss:$12 sps:$4 sm:$0xff]  }
 0x2e2   :  { %4759 = vmatprep.subr.bf16.mxu0 %v5479_v23  ;;  %v5509_v23 = vld [vmem:[%s6822_s4 + $0x2d8] ss:$12 sps:$4 sm:$0xff]  }
 0x2e3   :  { %3945 = vmatpush1.bf16.msra.mxu1 %v5471_v21  ;;  %v5505_v21 = vld [vmem:[%s6822_s4 + $0x200] ss:$12 sps:$4 sm:$0xff]  }
 0x2e4   :  { %3957 = vmatprep.subr.bf16.mxu1 %v5478_v22  ;;  %v5508_v22 = vld [vmem:[%s6822_s4 + $0x214] ss:$12 sps:$4 sm:$0xff]  }
 0x357   :  { %v2821_v27 = vpop.f32.mrb[12].mxu0  ;;  %v2950_v28 = vpop.f32.mrb[12].mxu1 }
 0x358   :  { %v4878_v29 = vadd.f32 %v2821_v27, %v1639_v25  ;;  %v4882_v30 = vadd.f32 %v2950_v28, %v1647_v26  ;;  %v2823_v31 = vpop.f32.mrb[13].mxu0  ;;  %v2952_v33 = vpop.f32.mrb[13].mxu1 }
 0x359   :  { %v4879_v36 = vadd.f32 %v2823_v31, %v1643_v38  ;;  %v4883_v37 = vadd.f32 %v2952_v33, %v1651_v39  ;;  %v2825_v42 = vpop.f32.mrb[14].mxu0  ;;  %v2954_v44 = vpop.f32.mrb[14].mxu1 }
 0x35a   :  { %v4880_v46 = vadd.f32 %v2825_v42, %v1639_v25  ;;  %v4884_v47 = vadd.f32 %v2954_v44, %v1647_v26  ;;  %v2827_v48 = vpop.f32.mrb[15].mxu0  ;;  %v2956_v49 = vpop.f32.mrb[15].mxu1  ;;  %v3082_v52 = vmax.f32 %v4878_v29, 0.0  ;;  %v3084_v54 = vmax.f32 %v4882_v30, 0.0  ;;  %v5513_v29 = vld [vmem:[%s6822_s4 + $0x22c] ss:$12 sps:$4 sm:$0xff]  }
 0x35b   :  { %v4881_v50 = vadd.f32 %v2827_v48, %v1643_v38  ;;  %v4885_v51 = vadd.f32 %v2956_v49, %v1651_v39  ;;  %v3083_v56 = vmax.f32 %v4879_v36, 0.0  ;;  %v3085_v57 = vmax.f32 %v4883_v37, 0.0  ;;  %v5506_v38 = vld [vmem:[%s6822_s4 + $0x210] ss:$12 sps:$4 sm:$0xff]   ;;  %v5510_v39 = vld [vmem:[%s6822_s4 + $0x218] ss:$12 sps:$4 sm:$0xff]  }
 0x35c   :  { %v3087_v55 = vmax.f32 %v4880_v46, 0.0  ;;  %v3089_v53 = vmax.f32 %v4884_v47, 0.0  ;;  %v1655_v26 = vrot.slane %v6555_v24, %v494_v4  ;;  %v5511_v46 = vld [vmem:[%s6822_s4 + $0x228] ss:$12 sps:$4 sm:$0xff]   ;;  %v5515_v47 = vld [vmem:[%s6822_s4 + $0x230] ss:$12 sps:$4 sm:$0xff]  }
 0x35d   :  { %v3088_v58 = vmax.f32 %v4881_v50, 0.0  ;;  %v3090_v59 = vmax.f32 %v4885_v51, 0.0  ;;  %v5518_v49 = vld [vmem:[%s6822_s4 + $0x244] ss:$12 sps:$4 sm:$0xff]  }
 0x35e   :  { %v3092_v60 = vpack.c.bf16 %v3087_v55, %v3082_v52  ;;  %v6566_v61 = vpack.c.bf16 %v3089_v53, %v3084_v54  ;;  %v5516_v52 = vld [vmem:[%s6822_s4 + $0x240] ss:$12 sps:$4 sm:$0xff]   ;;  %v5519_v54 = vld [vmem:[%s6822_s4 + $0x308] ss:$12 sps:$4 sm:$0xff]  }
 0x35f   :  { %v3093_v43 = vpack.c.bf16 %v3088_v58, %v3083_v56  ;;  %v3095_v40 = vpack.c.bf16 %v3090_v59, %v3085_v57  ;;  %v5522_v53 = vld [vmem:[%s6822_s4 + $0x25c] ss:$12 sps:$4 sm:$0xff]   ;;  %v5520_v56 = vld [vmem:[%s6822_s4 + $0x258] ss:$12 sps:$4 sm:$0xff]   ;;  %v5523_v57 = vld [vmem:[%s6822_s4 + $0x320] ss:$12 sps:$4 sm:$0xff]  }
 0x360   :  { %v5526_v58 = vld [vmem:[%s6822_s4 + $0x274] ss:$12 sps:$4 sm:$0xff]   ;;  %v5524_v59 = vld [vmem:[%s6822_s4 + $0x270] ss:$12 sps:$4 sm:$0xff]  }
 0x361   :  { %3946 = vmatprep.mubr.bf16.mxu1 %v3093_v43  ;;  %4075 = vmatprep.mubr.bf16.mxu0 %v3093_v43  ;;  %v5530_v43 = vld [vmem:[%s6822_s4 + $0x28c] ss:$12 sps:$4 sm:$0xff]  }
 0x362   :  { %3947 = vmatmul.mubr.bf16.vlgmr.msra.gmra.mrb[20].mxu1 %v3092_v60  ;;  %4076 = vmatmul.mubr.bf16.vlgmr.msra.gmra.mrb[24].mxu0 %v3092_v60  ;;  %v5527_v60 = vld [vmem:[%s6822_s4 + $0x338] ss:$12 sps:$4 sm:$0xff]  }
 0x363   :  { %3958 = vmatpush1.bf16.msra.mxu1 %v5476_v62  ;;  %4760 = vmatpush3.bf16.msra.mxu0 %v5480_v41  ;;  %v5531_v62 = vld [vmem:[%s6822_s4 + $0x350] ss:$12 sps:$4 sm:$0xff]  }
 0x364   :  { %3989 = vmatprep.mubr.bf16.mxu1 %v3095_v40  ;;  %4116 = vmatprep.mubr.bf16.mxu0 %v3095_v40  ;;  %v5528_v40 = vld [vmem:[%s6822_s4 + $0x288] ss:$12 sps:$4 sm:$0xff]   ;;  %v5534_v41 = vld [vmem:[%s6822_s4 + $0x2a4] ss:$12 sps:$4 sm:$0xff]  }
 0x365   :  { %3959 = vmatprep.subr.bf16.mxu1 %v5483_v63  ;;  %4761 = vmatprep.subr.bf16.mxu0 %v5484_v2  ;;  %v5532_v63 = vld [vmem:[%s6822_s4 + $0x2a0] ss:$12 sps:$4 sm:$0xff]   ;;  %v5535_v2 = vld [vmem:[%s6822_s4 + $0x368] ss:$12 sps:$4 sm:$0xff]  }
 0x367   :  { %3960 = vmatpush1.bf16.msra.mxu1 %v5481_v3  ;;  %4762 = vmatpush3.bf16.msra.mxu0 %v5485_v5  ;;  %v5538_v3 = vld [vmem:[%s6822_s4 + $0x2bc] ss:$12 sps:$4 sm:$0xff]   ;;  %v5536_v5 = vld [vmem:[%s6822_s4 + $0x2b8] ss:$12 sps:$4 sm:$0xff]  }
 0x368   :  { %3961 = vmatprep.subr.bf16.mxu1 %v5488_v7  ;;  %4763 = vmatprep.subr.bf16.mxu0 %v5489_v8  ;;  %v5539_v7 = vld [vmem:[%s6822_s4 + $0x380] ss:$12 sps:$4 sm:$0xff]  }
 0x369   :  { %v5542_v8 = vld [vmem:[%s6822_s4 + $0x2d4] ss:$12 sps:$4 sm:$0xff]  }
 0x36b   :  { %3962 = vmatpush1.bf16.msra.mxu1 %v5486_v9  ;;  %4764 = vmatpush3.bf16.msra.mxu0 %v5490_v10  ;;  %v5540_v10 = vld [vmem:[%s6822_s4 + $0x2d0] ss:$12 sps:$4 sm:$0xff]  }
 0x36c   :  { %3963 = vmatprep.subr.bf16.mxu1 %v5493_v11  ;;  %4765 = vmatprep.subr.bf16.mxu0 %v5494_v12  ;;  %v5543_v11 = vld [vmem:[%s6822_s4 + $0x398] ss:$12 sps:$4 sm:$0xff]  }
 0x36f   :  { %3964 = vmatpush1.bf16.msra.mxu1 %v5491_v13  ;;  %4766 = vmatpush3.bf16.msra.mxu0 %v5495_v14  ;;  %v5546_v14 = vld [vmem:[%s6822_s4 + $0x2ec] ss:$12 sps:$4 sm:$0xff]  }
 0x370   :  { %3965 = vmatprep.subr.bf16.mxu1 %v5498_v6  ;;  %4767 = vmatprep.subr.bf16.mxu0 %v5499_v15 }
 0x373   :  { %3966 = vmatpush1.bf16.msra.mxu1 %v5496_v16  ;;  %4768 = vmatpush3.bf16.msra.mxu0 %v5500_v17  ;;  %v5544_v17 = vld [vmem:[%s6822_s4 + $0x2e8] ss:$12 sps:$4 sm:$0xff]  }
 0x374   :  { %3967 = vmatprep.subr.bf16.mxu1 %v5503_v18  ;;  %4769 = vmatprep.subr.bf16.mxu0 %v5504_v19  ;;  %v5547_v18 = vld [vmem:[%s6822_s4 + $0x3b0] ss:$12 sps:$4 sm:$0xff]  }
 0x377   :  { %3968 = vmatpush1.bf16.msra.mxu1 %v5501_v20  ;;  %4770 = vmatpush3.bf16.msra.mxu0 %v5505_v21  ;;  %v4700_v25 = vpop.f32.mrb[16].mxu0  ;;  %v5550_v21 = vld [vmem:[%s6822_s4 + $0x304] ss:$12 sps:$4 sm:$0xff]  }
 0x378   :  { %v4722_v27 = vpop.f32.mrb[16].mxu1  ;;  %v4701_v28 = vpop.f32.mrb[17].mxu0  ;;  %3969 = vmatprep.subr.bf16.mxu1 %v5508_v22  ;;  %4771 = vmatprep.subr.bf16.mxu0 %v5509_v23  ;;  %v5548_v23 = vld [vmem:[%s6822_s4 + $0x300] ss:$12 sps:$4 sm:$0xff]  }
 0x379   :  { %v4702_v4 = vadd.f32 %v4701_v28, %v4700_v25  ;;  %v4723_v24 = vpop.f32.mrb[17].mxu1  ;;  %v4703_v30 = vpop.f32.mrb[18].mxu0  ;;  %v5553_v25 = vld [vmem:[%s6822_s4 + $0x31c] ss:$12 sps:$4 sm:$0xff]  }
 0x37a   :  { %v4724_v31 = vadd.f32 %v4723_v24, %v4722_v27  ;;  %v4725_v33 = vpop.f32.mrb[18].mxu1  ;;  %v4704_v36 = vpop.f32.mrb[19].mxu0  ;;  %v5560_v27 = vld [vmem:[%s6822_s4 + $0x360] ss:$12 sps:$4 sm:$0xff]   ;;  %v5565_v28 = vld [vmem:[%s6822_s4 + $0x37c] ss:$12 sps:$4 sm:$0xff]  }
 0x37b   :  { %v2994_v37 = vadd.f32 %v4702_v4, %v1655_v26  ;;  %v4705_v42 = vadd.f32 %v4704_v36, %v4703_v30  ;;  %v4726_v44 = vpop.f32.mrb[19].mxu1  ;;  %3970 = vmatpush1.bf16.msra.mxu1 %v5506_v38  ;;  %4772 = vmatpush3.bf16.msra.mxu0 %v5510_v39  ;;  %v5554_v38 = vld [vmem:[%s6822_s4 + $0x330] ss:$12 sps:$4 sm:$0xff]   ;;  %v5571_v24 = vld [vmem:[%s6822_s4 + $0x3ac] ss:$12 sps:$4 sm:$0xff]  }
 0x37c   :  { %v4727_v48 = vadd.f32 %v4726_v44, %v4725_v33  ;;  %3971 = vmatprep.subr.bf16.mxu1 %v5513_v29  ;;  %4773 = vmatprep.subr.bf16.mxu0 %v5514_v32  ;;  %v5562_v39 = vld [vmem:[%s6822_s4 + $0x364] ss:$12 sps:$4 sm:$0xff]   ;;  %v5568_v32 = vld [vmem:[%s6822_s4 + $0x394] ss:$12 sps:$4 sm:$0xff]  }
 0x37d   :  { %v2997_v50 = vadd.f32 %v4705_v42, %v1655_v26  ;;  %v3035_v51 = vadd.f32 %v4724_v31, %v2994_v37  ;;  %v5556_v26 = vld [vmem:[%s6822_s4 + $0x334] ss:$12 sps:$4 sm:$0xff]   ;;  %v5563_v29 = vld [vmem:[%s6822_s4 + $0x378] ss:$12 sps:$4 sm:$0xff]   ;;  %v5566_v4 = vld [vmem:[%s6822_s4 + $0x390] ss:$12 sps:$4 sm:$0xff]  }
 0x37e   :  { %v5569_v30 = vld [vmem:[%s6822_s4 + $0x3a8] ss:$12 sps:$4 sm:$0xff]  }
 0x37f   :  { %3972 = vmatpush1.bf16.msra.mxu1 %v5511_v46  ;;  %4774 = vmatpush3.bf16.msra.mxu0 %v5515_v47  ;;  %v3038_v55 = vadd.f32 %v4727_v48, %v2997_v50  ;;  %v3257_v46 = vld [vmem:[%s6823_s5 + $0xd] sm:$0x7] }
 0x380   :  { %3973 = vmatprep.subr.bf16.mxu1 %v5518_v49  ;;  %4850 = vmatprep.subr.bf16.mxu0 %v5626_v0  ;;  %v3270_v47 = vrot.slane %v3257_v46, %v5716_v45 }
 0x382   :  { %4117 = vmatmul.mubr.bf16.vlgmr.msra.gmra.mrb[28].mxu0 %v6566_v61 }
 0x383   :  { %3974 = vmatpush1.bf16.msra.mxu1 %v5516_v52  ;;  %4851 = vmatpush3.bf16.msra.mxu0 %v5519_v54 }
 0x384   :  { %3975 = vmatprep.subr.bf16.mxu1 %v5522_v53  ;;  %4852 = vmatprep.subr.bf16.mxu0 %v5626_v0 }
 0x385   :  { %4866 = vmatprep.mubr.msk.bf16.mxu0 %vm5628_vm0, %v5626_v0 }
 0x387   :  { %3976 = vmatpush1.bf16.msra.mxu1 %v5520_v56  ;;  %4853 = vmatpush3.bf16.msra.mxu0 %v5523_v57 }
 0x388   :  { %3977 = vmatprep.subr.bf16.mxu1 %v5526_v58  ;;  %4854 = vmatprep.subr.bf16.mxu0 %v5626_v0 }
 0x38b   :  { %3978 = vmatpush1.bf16.msra.mxu1 %v5524_v59  ;;  %4855 = vmatpush3.bf16.msra.mxu0 %v5527_v60 }
 0x38c   :  { %3979 = vmatprep.subr.bf16.mxu1 %v5530_v43  ;;  %4856 = vmatprep.subr.bf16.mxu0 %v5626_v0 }
 0x38f   :  { %3980 = vmatpush1.bf16.msra.mxu1 %v5528_v40  ;;  %4857 = vmatpush3.bf16.msra.mxu0 %v5531_v62  ;;  %v3262_v62 = vrot.slane %v3257_v46, %v5708_v34 }
 0x390   :  { %3981 = vmatprep.subr.bf16.mxu1 %v5534_v41  ;;  %4858 = vmatprep.subr.bf16.mxu0 %v5626_v0  ;;  %v3266_v41 = vrot.slane %v3257_v46, %v5711_v35 }
 0x393   :  { %3982 = vmatpush1.bf16.msra.mxu1 %v5532_v63  ;;  %4859 = vmatpush3.bf16.msra.mxu0 %v5535_v2 }
 0x394   :  { %3983 = vmatprep.subr.bf16.mxu1 %v5538_v3  ;;  %4860 = vmatprep.subr.bf16.mxu0 %v5626_v0 }
 0x397   :  { %3984 = vmatpush1.bf16.msra.mxu1 %v5536_v5  ;;  %4861 = vmatpush3.bf16.msra.mxu0 %v5539_v7  ;;  %v3075_v9 = vpop.f32.mrb[20].mxu0 }
 0x398   :  { %v3076_v12 = vadd.f32 %v3075_v9, %v3035_v51  ;;  %v4848_v13 = vpop.f32.mrb[21].mxu0  ;;  %3985 = vmatprep.subr.bf16.mxu1 %v5542_v8  ;;  %4862 = vmatprep.subr.bf16.mxu0 %v5626_v0 }
 0x399   :  { %v3078_v6 = vpop.f32.mrb[22].mxu0 }
 0x39a   :  { %v3079_v15 = vadd.f32 %v3078_v6, %v3038_v55  ;;  %v4849_v16 = vpop.f32.mrb[23].mxu0  ;;  %v3086_v19 = vmax.f32 %v3076_v12, 0.0 }
 0x39b   :  { %3986 = vmatpush1.bf16.msra.mxu1 %v5540_v10  ;;  %4863 = vmatpush3.bf16.msra.mxu0 %v5543_v11 }
 0x39c   :  { %v3091_v20 = vmax.f32 %v3079_v15, 0.0  ;;  %3987 = vmatprep.subr.bf16.mxu1 %v5546_v14  ;;  %4864 = vmatprep.subr.bf16.mxu0 %v5626_v0  ;;  %v5551_v0 = vld [vmem:[%s6822_s4 + $0x318] ss:$12 sps:$4 sm:$0xff]  }
 0x39e   :  { %v3096_v22 = vpack.c.bf16 %v3091_v20, %v3086_v19 }
 0x39f   :  { %3988 = vmatpush1.bf16.msra.mxu1 %v5544_v17  ;;  %4865 = vmatpush3.bf16.msra.mxu0 %v5547_v18 }
 0x3a0   :  { %4000 = vmatprep.subr.bf16.mxu1 %v5550_v21 }
 0x3a2   :  { %3990 = vmatmul.mubr.bf16.vlgmr.msra.gmra.mrb[20].mxu1 %v6566_v61  ;;  %4867 = vmatmul.mubr.bf16.vlgmr.msra.gmra.mrb[32].mxu0 %v3096_v22  ;;  %v5559_v61 = vld [vmem:[%s6822_s4 + $0x34c] ss:$12 sps:$4 sm:$0xff]  }
 0x3a3   :  { %4001 = vmatpush1.bf16.msra.mxu1 %v5548_v23  ;;  %4032 = vmatprep.mubr.bf16.mxu1 %v5627_v1  ;;  %v5557_v1 = vld [vmem:[%s6822_s4 + $0x348] ss:$12 sps:$4 sm:$0xff]  }
 0x3a4   :  { %4002 = vmatprep.subr.bf16.mxu1 %v5553_v25 }
 0x3a7   :  { %4003 = vmatpush1.bf16.msra.mxu1 %v5551_v0 }
 0x3a8   :  { %4004 = vmatprep.subr.bf16.mxu1 %v5556_v26 }
 0x3ab   :  { %4005 = vmatpush1.bf16.msra.mxu1 %v5554_v38 }
 0x3ac   :  { %4006 = vmatprep.subr.bf16.mxu1 %v5559_v61 }
 0x3af   :  { %4007 = vmatpush1.bf16.msra.mxu1 %v5557_v1 }
 0x3b0   :  { %4008 = vmatprep.subr.bf16.mxu1 %v5562_v39 }
 0x3b3   :  { %4009 = vmatpush1.bf16.msra.mxu1 %v5560_v27 }
 0x3b4   :  { %4010 = vmatprep.subr.bf16.mxu1 %v5565_v28 }
 0x3b7   :  { %4011 = vmatpush1.bf16.msra.mxu1 %v5563_v29 }
 0x3b8   :  { %4012 = vmatprep.subr.bf16.mxu1 %v5568_v32 }
 0x3bb   :  { %4013 = vmatpush1.bf16.msra.mxu1 %v5566_v4 }
 0x3bc   :  { %4014 = vmatprep.subr.bf16.mxu1 %v5571_v24 }
 0x3bf   :  { %4015 = vmatpush1.bf16.msra.mxu1 %v5569_v30 }
 0x3c2   :  { %4033 = vmatmul.mubr.bf16.vlgmr.msra.gmra.mrb[20].mxu1 %v3096_v22 }
 0x435   :  { %v4753_v31 = vpop.f32.mrb[24].mxu0 }
 0x436   :  { %v4754_v33 = vpop.f32.mrb[25].mxu0 }
 0x437   :  { %v4755_v36 = vadd.f32 %v4754_v33, %v4753_v31  ;;  %v4756_v37 = vpop.f32.mrb[26].mxu0 }
 0x438   :  { %v4757_v42 = vpop.f32.mrb[27].mxu0 }
 0x439   :  { %v4758_v44 = vadd.f32 %v4757_v42, %v4756_v37  ;;  %v4078_v50 = vadd.f32 %v4755_v36, %v3270_v47 }
 0x43b   :  { %v4081_v55 = vadd.f32 %v4758_v44, %v3270_v47 }
 0x455   :  { %v4775_v48 = vpop.f32.mrb[28].mxu0 }
 0x456   :  { %v4776_v49 = vpop.f32.mrb[29].mxu0 }
 0x457   :  { %v4777_v51 = vadd.f32 %v4776_v49, %v4775_v48  ;;  %v4778_v52 = vpop.f32.mrb[30].mxu0 }
 0x458   :  { %v4779_v54 = vpop.f32.mrb[31].mxu0 }
 0x459   :  { %v4780_v53 = vadd.f32 %v4779_v54, %v4778_v52  ;;  %v4119_v56 = vadd.f32 %v4777_v51, %v4078_v50 }
 0x45b   :  { %v4122_v57 = vadd.f32 %v4780_v53, %v4081_v55 }
 0x475   :  { %v4159_v58 = vpop.f32.mrb[32].mxu0 }
 0x476   :  { %v4160_v59 = vadd.f32 %v4159_v58, %v4119_v56  ;;  %v4868_v60 = vpop.f32.mrb[33].mxu0 }
 0x477   :  { %v4162_v43 = vpop.f32.mrb[34].mxu0 }
 0x478   :  { %4169 = vst.msk [vmem:[%s6824_s6 + $0x10] sm:$0xff] %vm4168_vm1, %v4160_v59  ;;  %v4163_v45 = vadd.f32 %v4162_v43, %v4122_v57  ;;  %v4869_v40 = vpop.f32.mrb[35].mxu0 }
 0x47a   :  { %4172 = vst.msk [vmem:[%s6824_s6 + $0x28] sm:$0xff] %vm4168_vm1, %v4163_v45 }
 0x495   :  { %v4034_v63 = vpop.f32.mrb[20].mxu1 }
 0x496   :  { %v4886_v2 = vadd.f32 %v4034_v63, %v3262_v62  ;;  %v4036_v3 = vpop.f32.mrb[21].mxu1 }
 0x497   :  { %v4887_v5 = vadd.f32 %v4036_v3, %v3266_v41  ;;  %v4038_v7 = vpop.f32.mrb[22].mxu1 }
 0x498   :  { %4166 = vst [vmem:[%s6824_s6] sm:$0xff] %v4886_v2  ;;  %v4888_v8 = vadd.f32 %v4038_v7, %v3262_v62  ;;  %v4040_v9 = vpop.f32.mrb[23].mxu1 }
 0x499   :  { %4167 = vst [vmem:[%s6824_s6 + $0x8] sm:$0xff] %v4887_v5  ;;  %v4889_v10 = vadd.f32 %v4040_v9, %v3266_v41 }
 0x49a   :  { %4170 = vst [vmem:[%s6824_s6 + $0x18] sm:$0xff] %v4888_v8 }
 0x49b   :  { %4171 = vst [vmem:[%s6824_s6 + $0x20] sm:$0xff] %v4889_v10 }
 0x49c   :  { %4177 = vsyncpa [#allocation3], 1 }
 0x49d   :  { %4178 = vsyncpa [#allocation5], 1 }

</bundles_post_ra>
